<compile_context>
chip_gen: v5e
topology: v5e:2x2
jax: 0.10.0
libtpu: 0.0.40
codegen_flags: <defaults>
</compile_context>

<pallas_src>
import jax
import jax.numpy as jnp
from jax.experimental import pallas as pl
from jax.experimental.pallas import tpu as pltpu


def discriminator_kernel(x_ref, w1_ref, b1_ref, w2_ref, b2_ref, out_ref):
    # fc1 on the MXU: cast the streamed f32 tile to bf16 in-kernel (no extra
    # HBM pass in the wrapper), f32 accumulation.
    x_bf16 = x_ref[...].astype(jnp.bfloat16)
    h = jnp.dot(x_bf16, w1_ref[...], preferred_element_type=jnp.float32)
    h = jnp.maximum(h + b1_ref[...], 0.0)  # bias broadcast + ReLU (VPU)

    # fc2: contract the hidden dim of w2 (1, 128) against h (TB, 128) -> (1, TB).
    # Lane-dense logit row; avoids a degenerate N=1 matmul / (128, 1) weight tile.
    logit = jnp.einsum(
        "od,td->ot", w2_ref[...], h, preferred_element_type=jnp.float32
    )
    logit = logit + b2_ref[0]  # scalar bias from SMEM

    # Numerically stable sigmoid. Exact reciprocal: EUP/VPU are idle relative to
    # the x DMA, and approx=True could push outputs marginally above 1.0.
    e = jnp.exp(-jnp.abs(logit))
    sig_pos = pl.reciprocal(1.0 + e, approx=False)     # sigmoid(|logit|)
    sig = jnp.where(logit >= 0.0, sig_pos, 1.0 - sig_pos)

    out_ref[...] = sig.reshape(out_ref.shape).astype(out_ref.dtype)


def discriminator_forward(x, w1, b1, w2, b2, *, tb=2048):
    """x: (B, 784) f32. w1: (784, 128), b1: (128,), w2: (1, 128), b2: (1,)."""
    B, F = x.shape
    H = w1.shape[1]

    # --- batch-tile selection ---
    # Keep tb a multiple of 128 (lane-dense output, sublane-aligned x blocks)
    # and never larger than the 128-padded batch.
    tb = min(tb, 128 * pl.cdiv(B, 128))
    # v7x has 2 TensorCores sharing the "parallel" batch axis: when the batch
    # allows, cap tb so the grid has at least 2 steps (both cores get work).
    if B > 128:
        tb = min(tb, 128 * pl.cdiv(pl.cdiv(B, 2), 128))
    tb = max(tb, 128)
    g = pl.cdiv(B, tb)

    # Weights/biases: tiny, converted once; they stay VMEM-resident across the
    # whole grid (constant index_maps below).
    w1_bf16 = w1.astype(jnp.bfloat16)
    b1_row = b1.reshape(1, H).astype(jnp.float32)
    w2_row = w2.reshape(1, H).astype(jnp.float32)
    b2_vec = b2.reshape(1).astype(jnp.float32)

    # Small-tile deployments: keep an extra x DMA in flight across the ~0.35 us
    # per-step prologue. Irrelevant (and skipped) once the tile is big.
    x_spec_kwargs = {}
    if tb < 2048 and g >= 4:
        x_spec_kwargs["pipeline_mode"] = pl.Buffered(3)

    out = pl.pallas_call(
        discriminator_kernel,
        out_shape=jax.ShapeDtypeStruct((g, 1, tb), jnp.float32),
        grid_spec=pltpu.PrefetchScalarGridSpec(
            num_scalar_prefetch=0,
            grid=(g,),
            in_specs=[
                # x: streamed f32 batch tiles (pipelined against compute). The
                # ragged final tile relies on Pallas block-boundary padding;
                # garbage rows only reach output rows sliced off below.
                pl.BlockSpec((tb, F), lambda i: (i, 0), **x_spec_kwargs),
                # w1 / b1 / w2: constant index_map -> resident across steps.
                pl.BlockSpec((F, H), lambda i: (0, 0)),
                pl.BlockSpec((1, H), lambda i: (0, 0)),
                pl.BlockSpec((1, H), lambda i: (0, 0)),
                # b2: scalar in SMEM (no padded VMEM tile / extra DMA stream).
                pl.BlockSpec(memory_space=pltpu.MemorySpace.SMEM),
            ],
            # Lane-dense (1, 1, TB) output rows; reshaped to (B, 1) below.
            out_specs=pl.BlockSpec((1, 1, tb), lambda i: (i, 0, 0)),
        ),
        compiler_params=pltpu.CompilerParams(
            dimension_semantics=("parallel",),
            # f32-streamed x at tb=2048 with the 784->896 lane pad is ~7.3 MiB
            # per buffer (~15 MiB double-buffered): over v5e's 16 MiB scoped
            # default, comfortably under v7x's 64 MiB/TC physical VMEM.
            vmem_limit_bytes=48 * 1024 * 1024,
        ),
    )(x, w1_bf16, b1_row, w2_row, b2_vec)

    return out.reshape(g * tb, 1)[:B]


def init_params(key):
    # Mirrors weight_init(mean=0.0, std=0.075) on the PyTorch module, with w1
    # stored as (in_features, out_features) so the kernel computes x @ W1.
    k1, k2, k3, k4 = jax.random.split(key, 4)
    std = 0.075
    w1 = std * jax.random.normal(k1, (784, 128), dtype=jnp.float32)
    b1 = std * jax.random.normal(k2, (128,), dtype=jnp.float32)
    w2 = std * jax.random.normal(k3, (1, 128), dtype=jnp.float32)  # torch fc2.weight shape
    b2 = std * jax.random.normal(k4, (1,), dtype=jnp.float32)
    return w1, b1, w2, b2


if __name__ == "__main__":
    key = jax.random.PRNGKey(0)
    pkey, xkey = jax.random.split(key)
    w1, b1, w2, b2 = init_params(pkey)

    # Small batch that is not a multiple of the tile -> exercises both the
    # multi-tile pipeline (g=2) and the ragged-last-tile boundary path.
    B = 300
    x = jax.random.normal(xkey, (B, 784), dtype=jnp.float32)

    out = discriminator_forward(x, w1, b1, w2, b2)
    out = jax.block_until_ready(out)

    assert out.shape == (B, 1)
    # Asserts are on the sliced (valid) rows only; rows beyond B were never kept.
    assert bool(jnp.all(jnp.isfinite(out)))
    assert bool(jnp.all((out >= 0.0) & (out <= 1.0)))

    # Reference with the same bf16 rounding applied to the fc1 inputs
    # (deliberate ~1e-3-level deviation from a pure-f32 PyTorch forward).
    xb = x.astype(jnp.bfloat16).astype(jnp.float32)
    w1b = w1.astype(jnp.bfloat16).astype(jnp.float32)
    h_ref = jnp.maximum(xb @ w1b + b1[None, :], 0.0)
    ref = jax.nn.sigmoid(h_ref @ w2.T + b2[None, :])
    assert bool(jnp.allclose(out, ref, atol=2e-3, rtol=0.0))

    print("KERNEL_OK")
</pallas_src>

<mosaic_0001>
module attributes {stable_mosaic.version = 11 : i64} {
  func.func @discriminator_kernel(%arg0: i32, %arg1: memref<256x784xf32, #tpu.memory_space<vmem>>, %arg2: memref<784x128xbf16, #tpu.memory_space<vmem>>, %arg3: memref<1x128xf32, #tpu.memory_space<vmem>>, %arg4: memref<1x128xf32, #tpu.memory_space<vmem>>, %arg5: memref<1xf32, #tpu.memory_space<smem>>, %arg6: memref<1x1x256xf32, #tpu.memory_space<vmem>>) attributes {dimension_semantics = [#tpu.dimension_semantics<parallel>], iteration_bounds = array<i64: 2>, scalar_prefetch = 0 : i64, scratch_operands = 0 : i64, tpu.core_type = #tpu.core_type<tc>, window_params = [{transform_indices = @transform_0, window_bounds = array<i64: 256, 784>}, {pipeline_mode = #tpu.pipeline_mode<synchronous>, transform_indices = @transform_1, window_bounds = array<i64: 784, 128>}, {pipeline_mode = #tpu.pipeline_mode<synchronous>, transform_indices = @transform_2, window_bounds = array<i64: 1, 128>}, {pipeline_mode = #tpu.pipeline_mode<synchronous>, transform_indices = @transform_3, window_bounds = array<i64: 1, 128>}, {transform_indices = @transform_4, window_bounds = array<i64: 1>}, {transform_indices = @transform_5, window_bounds = array<i64: 1, 1, 256>}]} {
    %c0 = arith.constant 0 : index
    %c0_0 = arith.constant 0 : index
    %0 = vector.load %arg1[%c0, %c0_0] : memref<256x784xf32, #tpu.memory_space<vmem>>, vector<256x784xf32>
    %1 = arith.truncf %0 : vector<256x784xf32> to vector<256x784xbf16>
    %c0_1 = arith.constant 0 : index
    %c0_2 = arith.constant 0 : index
    %2 = vector.load %arg2[%c0_1, %c0_2] : memref<784x128xbf16, #tpu.memory_space<vmem>>, vector<784x128xbf16>
    %cst = arith.constant dense<0.000000e+00> : vector<256x128xf32>
    %3 = tpu.matmul %1, %2, %cst {dimension_numbers = #tpu.dot_dimension_numbers<[1], [0], [0], [1], [0, 0, 1, 1], [], []>} : vector<256x784xbf16>, vector<784x128xbf16>, vector<256x128xf32> -> vector<256x128xf32>
    %c0_3 = arith.constant 0 : index
    %c0_4 = arith.constant 0 : index
    %4 = vector.load %arg3[%c0_3, %c0_4] : memref<1x128xf32, #tpu.memory_space<vmem>>, vector<1x128xf32>
    %5 = vector.broadcast %4 : vector<1x128xf32> to vector<256x128xf32>
    %6 = arith.addf %3, %5 : vector<256x128xf32>
    %cst_5 = arith.constant 0.000000e+00 : f32
    %7 = vector.broadcast %cst_5 : f32 to vector<256x128xf32>
    %8 = arith.maximumf %6, %7 : vector<256x128xf32>
    %c0_6 = arith.constant 0 : index
    %c0_7 = arith.constant 0 : index
    %9 = vector.load %arg4[%c0_6, %c0_7] : memref<1x128xf32, #tpu.memory_space<vmem>>, vector<1x128xf32>
    "tpu.trace_start"() <{level = 10 : i32, message = "od,td->ot"}> : () -> ()
    %cst_8 = arith.constant dense<0.000000e+00> : vector<1x256xf32>
    %10 = tpu.matmul %9, %8, %cst_8 {dimension_numbers = #tpu.dot_dimension_numbers<[1], [1], [0], [0], [0, 0, 1, 0], [], []>} : vector<1x128xf32>, vector<256x128xf32>, vector<1x256xf32> -> vector<1x256xf32>
    "tpu.trace_stop"() : () -> ()
    %c0_9 = arith.constant 0 : index
    %11 = memref.load %arg5[%c0_9] : memref<1xf32, #tpu.memory_space<smem>>
    %12 = vector.broadcast %11 : f32 to vector<1x256xf32>
    %13 = arith.addf %10, %12 : vector<1x256xf32>
    %14 = math.absf %13 : vector<1x256xf32>
    %cst_10 = arith.constant 0.000000e+00 : f32
    %15 = vector.broadcast %cst_10 : f32 to vector<1x256xf32>
    %16 = arith.subf %15, %14 : vector<1x256xf32>
    %17 = math.exp %16 : vector<1x256xf32>
    %cst_11 = arith.constant 1.000000e+00 : f32
    %18 = vector.broadcast %cst_11 : f32 to vector<1x256xf32>
    %19 = arith.addf %18, %17 : vector<1x256xf32>
    %20 = tpu.reciprocal %19 : vector<1x256xf32> -> vector<1x256xf32>
    %cst_12 = arith.constant 0.000000e+00 : f32
    %21 = vector.broadcast %cst_12 : f32 to vector<1x256xf32>
    %22 = arith.cmpf oge, %13, %21 : vector<1x256xf32>
    %cst_13 = arith.constant 1.000000e+00 : f32
    %23 = vector.broadcast %cst_13 : f32 to vector<1x256xf32>
    %24 = arith.subf %23, %20 : vector<1x256xf32>
    %25 = arith.select %22, %20, %24 : vector<1x256xi1>, vector<1x256xf32>
    %26 = vector.shape_cast %25 : vector<1x256xf32> to vector<1x1x256xf32>
    %c0_14 = arith.constant 0 : index
    %c0_15 = arith.constant 0 : index
    %c0_16 = arith.constant 0 : index
    %27 = vector.load %arg6[%c0_14, %c0_15, %c0_16] : memref<1x1x256xf32, #tpu.memory_space<vmem>>, vector<1x1x256xf32>
    tpu.vector_store %arg6[%c0_14, %c0_15, %c0_16], %26 {strides = array<i32>} : memref<1x1x256xf32, #tpu.memory_space<vmem>>, vector<1x1x256xf32>,
    return
  }
  func.func @transform_0(%arg0: i32) -> (i32, i32) {
    %c0_i32 = arith.constant 0 : i32
    %c0_i32_0 = arith.constant 0 : i32
    return %arg0, %c0_i32 : i32, i32
  }
  func.func @transform_1(%arg0: i32) -> (i32, i32) {
    %c0_i32 = arith.constant 0 : i32
    %c0_i32_0 = arith.constant 0 : i32
    %c0_i32_1 = arith.constant 0 : i32
    return %c0_i32, %c0_i32_0 : i32, i32
  }
  func.func @transform_2(%arg0: i32) -> (i32, i32) {
    %c0_i32 = arith.constant 0 : i32
    %c0_i32_0 = arith.constant 0 : i32
    %c0_i32_1 = arith.constant 0 : i32
    return %c0_i32, %c0_i32_0 : i32, i32
  }
  func.func @transform_3(%arg0: i32) -> (i32, i32) {
    %c0_i32 = arith.constant 0 : i32
    %c0_i32_0 = arith.constant 0 : i32
    %c0_i32_1 = arith.constant 0 : i32
    return %c0_i32, %c0_i32_0 : i32, i32
  }
  func.func @transform_4(%arg0: i32) -> i32 {
    %c0_i32 = arith.constant 0 : i32
    %c0_i32_0 = arith.constant 0 : i32
    return %c0_i32 : i32
  }
  func.func @transform_5(%arg0: i32) -> (i32, i32, i32) {
    %c0_i32 = arith.constant 0 : i32
    %c0_i32_0 = arith.constant 0 : i32
    %c0_i32_1 = arith.constant 0 : i32
    return %arg0, %c0_i32, %c0_i32_0 : i32, i32, i32
  }
}

</mosaic_0001>

<bundles_post_ra>
// kernel: tpu_custom_call.1
= control target key start
LH: loop header
LB: loop body
LE: loop exit
PB: predicated region body
PF: predicated region fallthrough
CT: control target
= control target key end

     0   :  { %s3364_s0 = inlined_call_operand.hbm [shape: f32[300,784], index: 0, kind: input, shape index: {}]   ;;  %s3365_s1 = inlined_call_operand.hbm [shape: bf16[784,128], index: 1, kind: input, shape index: {}]   ;;  %s3366_s2 = inlined_call_operand.hbm [shape: f32[1,128], index: 2, kind: input, shape index: {}]   ;;  %s3367_s3 = inlined_call_operand.hbm [shape: f32[1,128], index: 3, kind: input, shape index: {}]   ;;  %s3368_s4 = inlined_call_operand.<no memory space> [shape: f32[1], index: 4, kind: input, shape index: {}]   ;;  %s3369_s5 = inlined_call_operand.hbm [shape: f32[2,1,256], index: 5, kind: output, shape index: {}]  }
   0x1   :  { %10 = sst [smem:[#allocation2]] %s3368_s4 }
   0x2   :  { %11 = vsyncpa [#allocation4], 0 }
   0x3   :  { %13 = vsyncpa [#allocation4 + $0x1], 0 }
   0x4   :  { %14 = vsyncpa [#allocation7], 0 }
   0x5   :  { %15 = vsyncpa [#allocation10], 0 }
   0x6   :  { %16 = vsyncpa [#allocation5], 0 }
   0x7   :  { %18 = vsyncpa [#allocation5 + $0x1], 0  ;;  %s2597_s20 = smov 0   ;;  %s2599_s21 = smov 0  }
   0x8   :  { %s2601_s22 = smov 0   ;;  %s2603_s23 = smov 0  }
   0x9 LB: > { %s2618_s4 = sadd.s32 4294967295, %s2554_s23   ;;  %s1957_s24 = sadd.s32 4294967294, %s2554_s23   ;;  %s2554_s23 = sphi %s2603_s23, %s3398_s23   ;;  %s2550_s22 = sphi %s2601_s22, %s3397_s22   ;;  %s2546_s21 = sphi %s2599_s21, %s3396_s21   ;;  %s2542_s20 = sphi %s2597_s20, %s3395_s20  }
   0xa   : > { %s2622_s25 = sadd.s32 1, %s2554_s23   ;;  %s31_s26 = sadd.s32 1, %s2550_s22 }
   0xb   : > { %s28_s27 = ssub.s32 %s2554_s23, %s2622_s25  ;;  %p38_p0 = scmp.ne.s32.totalorder %s2550_s22, %s2546_s21 }
   0xc   : > { %p29_p1 = scmp.eq.s32.totalorder %s28_s27, 0  ;;  %p39_p2 = scmp.eq.s32.totalorder %s2554_s23, 0 }
   0xd   : > { %p44_p3 = scmp.ne.s32.totalorder %s2546_s21, %s2542_s20  ;;  %p3371_p4 = scmp.eq.s32.totalorder %s2618_s4, 0 }
   0xe   : > { %s2634_s28 = scalar_select %p29_p1, %s2550_s22, %s31_s26  }
   0xf   : > { %p2636_p5 = por %p39_p2, %p38_p0  ;;  %p2642_p6 = por %p3371_p4, %p44_p3 }
  0x10   : > { %p152_p7 = scmp.eq.s32.totalorder %s2618_s4, 1  ;;  %p158_p8 = scmp.eq.s32.totalorder %s1957_s24, 1 }
  0x11   : > { %p1958_p9 = scmp.ge.s32.totalorder %s2554_s23, 1  ;;  %p165_p10 = scmp.lt.s32.totalorder %s2554_s23, 3 }
  0x12   : > { %p2649_p11 = por %p152_p7, %p38_p0  ;;  %p2653_p12 = por %p158_p8, %p44_p3 }
  0x13   : > { %p2657_p13 = pnand %p1958_p9, %p165_p10  ;;  %s176_s11 = sshll.u32 %s3365_s1, 4  ;;  %s177_s11 = int_to_ptr.hbm [resolvable:$true] %s176_s11 }
  0x14   : > { %s3375_s7 = scalar_select %p2653_p12, 1, 0 }
  0x15   : > { %p2282_p1 = pneg %p2657_p13  ;;  %s2556_s12 = smov [#allocation6]  }
  0x16   : > { %s178_s13 = sshll.u32 %s2556_s12, 4  ;;  %s191_s17 = sshll.u32 %s3366_s2, 4  ;;  %s179_s13 = int_to_ptr.vmem [resolvable:$true] %s178_s13  ;;  %s192_s17 = int_to_ptr.hbm [resolvable:$true] %s191_s17 }
  0x17   : > { %p2668_p0 = pnand %p2282_p1, %p3371_p4  ;;  %s2557_s18 = smov 64  }
  0x18   : > { %s2558_s19 = smov 4   ;;  %s203_s27 = sshll.u32 %s3367_s3, 4  ;;  %s204_s27 = int_to_ptr.hbm [resolvable:$true] %s203_s27 }
  0x19   : > { %2285 = dma.hbm_to_vmem [thread:$0]  (!%p2668_p0), %s177_s11, 6272, %s179_s13, [#allocation7], %s2557_s18, %s2557_s18, %s2558_s19  }
  0x1a   : > { %s2559_s9 = smov [#allocation8]   ;;  %s2560_s12 = smov [#allocation9]  }
  0x1b   : > { %s193_s10 = sshll.u32 %s2559_s9, 4  ;;  %s205_s15 = sshll.u32 %s2560_s12, 4  ;;  %s194_s10 = int_to_ptr.vmem [resolvable:$true] %s193_s10  ;;  %s206_s15 = int_to_ptr.vmem [resolvable:$true] %s205_s15 }
  0x1c   : > { %2288 = dma.hbm_to_vmem [thread:$0]  (!%p2668_p0), %s192_s17, 16, %s194_s10, [#allocation7]  }
  0x1d   : > { %2291 = dma.hbm_to_vmem [thread:$0]  (!%p2668_p0), %s204_s27, 16, %s206_s15, [#allocation10]  }
  0x1e   : > { %p3370_p2 = scmp.ge.s32.totalorder %s2554_s23, 2 }
  0x20   : > { %215 = sbr.rel (%p3370_p2) target bundleno = 78 (0x4e), region = 32 }
  0x25   : > { %218 = sbr.rel (!%p2636_p5) target bundleno = 78 (0x4e), region = 36  ;;  %s219_s11 = sand.u32 (%p2636_p5), 1, %s2550_s22  }
  0x26   : > { %s1963_s13 = sshll.u32 (%p2636_p5), %s2554_s23, 5  ;;  %s2264_s16 = smul.u32 (%p2636_p5), 1792, %s219_s11 }
  0x27   : > { %s225_s18 = ssub.s32 (%p2636_p5), 38, %s1963_s13  ;;  %s2691_s24 = scalar_lea.sflag (%p2636_p5), [#allocation4], %s219_s11 }
  0x28   : > { %p226_p3 = scmp.lt.s32.totalorder (%p2636_p5), %s225_s18, 32  ;;  %s223_s26 = scalar_lea.vmem (%p2636_p5), [#allocation3], %s2264_s16 }
  0x2a   : > { %s3400_s18 = smov (!%p226_p3, %s225_s18), 32 }
  0x2b   : > { %s1965_s17 = smul.u32 56, %s3400_s18 }
  0x2d   : > { %s230_s19 = ssub.s32 1792, %s1965_s17 }
  0x2e   : > { %s231_s14 = sshll.u32 %s230_s19, 4 }
  0x2f   : > { %232 = vsyncadd %s2691_s24, %s231_s14  ;;  %p2694_p7 = scmp.ne.s32.totalorder %s1965_s17, 0  ;;  %s2265_s27 = smul.u32 1792, %s2554_s23 }
  0x30   : > { %s2699_s9 = sshll.u32 %s223_s26, 4  ;;  %s2701_s10 = smul.u32 896, %s3400_s18  ;;  %s241_s9 = int_to_ptr.vmem [resolvable:$true] %s2699_s9 }
  0x31   : > { %s236_s11 = scalar_lea.hbm %s3364_s0, %s2265_s27  ;;  %s2452_s27 = scalar_lea.hbm %s3364_s0, 2128 }
  0x32   : > { %s238_s13 = sshll.u32 %s236_s11, 4  ;;  %s2443_s17 = sshrl.u32 %s2701_s10, 4  ;;  %s2707_s13 = int_to_ptr.hbm [resolvable:$true] %s238_s13 }
  0x33   : > { %s2441_s16 = sshra.s32 %s2707_s13, 4  ;;  %s2479_s19 = sshll.u32 %s2443_s17, 4  ;;  %s2442_s16 = int_to_ptr.hbm [resolvable:$true] %s2441_s16 }
  0x34   : > { %p2445_p5 = scmp.ne.s32.totalorder %s2479_s19, %s2701_s10  ;;  %s2446_s14 = sadd.s32 1, %s2443_s17 }
  0x35   : > { %p2453_p1 = scmp.lt.s32.totalorder %s2442_s16, %s3364_s0 }
  0x36   : > { %s3402_s14 = smov (!%p2445_p5, %s2446_s14), %s2443_s17 }
  0x37   : > { %s2448_s18 = scalar_lea.hbm %s2442_s16, %s3402_s14 }
  0x38   : > { %p2449_p8 = scmp.ne.s32.totalorder %s2442_s16, %s2448_s18  ;;  %p2454_p0 = scmp.lt.s32.totalorder %s2452_s27, %s2448_s18 }
  0x3a   : > { %p2450_p9 = pnand %p2449_p8, %p2694_p7  ;;  %p2455_p3 = por %p2454_p0, %p2453_p1 }
  0x3c   : > { %p2451_p10 = pneg %p2450_p9 }
  0x3e   : > { %p2456_p2 = pnand %p2455_p3, %p2451_p10 }
  0x40   : > { %2459 = shalt.err (!%p2456_p2)
}
  0x41   : > { %s2460_s17 = sshra.s32 %s241_s9, 4  ;;  %s2561_s26 = smov [#allocation3]   ;;  %s2461_s17 = int_to_ptr.vmem [resolvable:$true] %s2460_s17 }
  0x42   : > { %s2467_s19 = scalar_lea.vmem %s2461_s17, %s3402_s14  ;;  %s2471_s12 = scalar_lea.vmem %s2561_s26, 3584 }
  0x43   : > { %p2468_p5 = scmp.ne.s32.totalorder %s2461_s17, %s2467_s19  ;;  %p2473_p4 = scmp.lt.s32.totalorder %s2471_s12, %s2467_s19 }
  0x45   : > { %p2469_p8 = pnand %p2468_p5, %p2694_p7 }
  0x47   : > { %p2470_p9 = pneg %p2469_p8 }
  0x49   : > { %p2475_p12 = pnand %p2473_p4, %p2470_p9 }
  0x4b   : > { %2478 = shalt.err (!%p2475_p12)
}
  0x4c   : > { %s2562_s16 = smov 896   ;;  %s2563_s18 = smov 56  }
  0x4d   : > { %246 = dma.hbm_to_vmem [thread:$0]  (%p2694_p7), %s2707_s13, %s2701_s10, %s241_s9, %s2691_s24, %s2562_s16, %s2562_s16, %s2563_s18  }
  0x4e PF: > { %252 = sbr.rel (%p2657_p13) target bundleno = 974 (0x3ce), region = 40 }
  0x53   : > { %s2734_s14 = sand.u32 1, %s2546_s21  }
  0x54   : > { %s2266_s27 = smul.u32 1792, %s2734_s14  ;;  %s255_s15 = scalar_lea.sflag [#allocation4], %s2734_s14 }
  0x56   : > { %s2738_s11 = scalar_lea.vmem [#allocation3], %s2266_s27 }
  0x57   : > { %2525 = dma.done.wait (%p2642_p6), %s255_s15, 28672  }
  0x58   : > { %2527 = vsyncadd (%p2642_p6), %s255_s15, 4294938624  ;;  %p3379_p4 = scmp.eq.s32.totalorder %s2618_s4, 0 }
  0x5a   : > { %2529 = dma.done.wait (%p3379_p4), [#allocation7], 6288   ;;  %p3380_p12 = pmov %p3379_p4 }
  0x5b   : > { %p3381_p13 = pmov %p3379_p4 }
  0x5c   : > { %2531 = vsyncadd (%p3380_p12), [#allocation7], 4294961008 }
  0x5d   : > { %2533 = dma.done.wait (%p3381_p13), [#allocation10], 16   ;;  %p3382_p2 = pmov %p3379_p4 }
  0x5e   : > { %v2198_v0 = vld [vmem:[#allocation6 + $0x38] sm:$0xff]  ;;  %v2197_v3 = vld [vmem:[#allocation6 + $0x30] sm:$0xff]  ;;  %v2196_v6 = vld [vmem:[#allocation6 + $0x28] sm:$0xff]  ;;  %vm1040_vm0 = vcmask 130048   ;;  %s1745_s30 = sld [smem:[#allocation2]]  ;;  %s1974_s8 = sshll.u32 %s2734_s14, 1 }
  0x5f   : > { %2535 = vsyncadd (%p3382_p2), [#allocation10], 4294967280  ;;  %v2752_v1 = vld [vmem:[#allocation6 + $0x78] sm:$0xff]  ;;  %1089 = vmatpush.bf16.msra.mxu0 %v2198_v0  ;;  %2240 = vmatpush.bf16.msra.mxu3 %v2198_v0  ;;  %v2758_v4 = vld [vmem:[#allocation6 + $0x70] sm:$0xff]  ;;  %s2188_s24 = sshll.u32 %s2618_s4, 1  ;;  %s300_s13 = scalar_lea.vmem [#allocation11], %s1974_s8 }
  0x60   : > { %v2754_v2 = vld [vmem:[#allocation6 + $0xb8] sm:$0xff]  ;;  %1178 = vmatpush.bf16.msra.mxu1 %v2752_v1  ;;  %v2760_v5 = vld [vmem:[#allocation6 + $0xb0] sm:$0xff]  ;;  %v2204_v7 = vld [vmem:[#allocation6 + $0x68] sm:$0xff]  ;;  %s1853_s10 = scalar_lea.hbm %s3369_s5, %s2188_s24  ;;  %s1855_s4 = sshll.u32 %s300_s13, 4  ;;  %vm1834_vm11 = vcmask 1040384   ;;  %s1856_s4 = int_to_ptr.vmem [resolvable:$true] %s1855_s4 }
  0x61   : > { %1267 = vmatpush.bf16.msra.mxu2 %v2754_v2  ;;  %v2764_v8 = vld [vmem:[#allocation6 + $0xa8] sm:$0xff]  ;;  %v2195_v9 = vld [vmem:[#allocation6 + $0x20] sm:$0xff]  ;;  %v2194_v12 = vld [vmem:[#allocation6 + $0x18] sm:$0xff]  ;;  %s1857_s17 = sshll.u32 %s1853_s10, 4  ;;  %s1843_s19 = scalar_lea.sflag [#allocation5], %s2734_s14  ;;  %s1858_s17 = int_to_ptr.hbm [resolvable:$true] %s1857_s17 }
  0x62   : > { %v2203_v10 = vld [vmem:[#allocation6 + $0x60] sm:$0xff]  ;;  %v2202_v13 = vld [vmem:[#allocation6 + $0x58] sm:$0xff]  ;;  %v2193_v15 = vld [vmem:[#allocation6 + $0x10] sm:$0xff]  ;;  %s2494_s26 = sshra.s32 %s1858_s17, 4  ;;  %s2500_s27 = scalar_lea.hbm %s3369_s5, 4  ;;  %s2495_s26 = int_to_ptr.hbm [resolvable:$true] %s2494_s26 }
  0x63   : > { %1090 = vmatpush.bf16.msra.mxu0 %v2197_v3  ;;  %2241 = vmatpush.bf16.msra.mxu3 %v2197_v3  ;;  %v2767_v11 = vld [vmem:[#allocation6 + $0xa0] sm:$0xff]  ;;  %v2770_v14 = vld [vmem:[#allocation6 + $0x98] sm:$0xff]  ;;  %v2201_v16 = vld [vmem:[#allocation6 + $0x50] sm:$0xff]  ;;  %s2496_s12 = scalar_lea.hbm %s2495_s26, 2  ;;  %p2501_p1 = scmp.lt.s32.totalorder %s2495_s26, %s3369_s5 }
  0x64   : > { %1179 = vmatpush.bf16.msra.mxu1 %v2758_v4  ;;  %v2773_v17 = vld [vmem:[#allocation6 + $0x90] sm:$0xff]  ;;  %v2192_v18 = vld [vmem:[#allocation6 + $0x8] sm:$0xff]  ;;  %v2191_v21 = vld [vmem:[#allocation6] sm:$0xff]  ;;  %p2497_p6 = scmp.ne.s32.totalorder %s2495_s26, %s2496_s12  ;;  %p2502_p0 = scmp.lt.s32.totalorder %s2500_s27, %s2496_s12 }
  0x65   : > { %1268 = vmatpush.bf16.msra.mxu2 %v2760_v5  ;;  %v2200_v19 = vld [vmem:[#allocation6 + $0x48] sm:$0xff]  ;;  %v2199_v22 = vld [vmem:[#allocation6 + $0x40] sm:$0xff]  ;;  %v315_v25 = vld [vmem:[%s2738_s11 + $0x38] sm:$0xff] }
  0x66   : > { %v2776_v20 = vld [vmem:[#allocation6 + $0x88] sm:$0xff]  ;;  %v2778_v23 = vld [vmem:[#allocation6 + $0x80] sm:$0xff]  ;;  %v511_v27 = vld [vmem:[%s2738_s11 + $0x658] sm:$0xff]  ;;  %p2498_p7 = pnand %p2497_p6, %p2649_p11  ;;  %p2503_p3 = por %p2502_p0, %p2501_p1 }
  0x67   : > { %1091 = vmatpush.bf16.msra.mxu0 %v2196_v6  ;;  %2242 = vmatpush.bf16.msra.mxu3 %v2196_v6  ;;  %v308_v24 = vld [vmem:[%s2738_s11] sm:$0xff]  ;;  %v309_v28 = vld [vmem:[%s2738_s11 + $0x8] sm:$0xff]  ;;  %v310_v30 = vld [vmem:[%s2738_s11 + $0x10] sm:$0xff] }
  0x68   : > { %1180 = vmatpush.bf16.msra.mxu1 %v2204_v7  ;;  %v504_v26 = vld [vmem:[%s2738_s11 + $0x620] sm:$0xff]  ;;  %v317_v31 = vld [vmem:[%s2738_s11 + $0x48] sm:$0xff]  ;;  %v532_v32 = vpack.c.bf16 %v315_v25, %v308_v24  ;;  %v322_v36 = vld [vmem:[%s2738_s11 + $0x70] sm:$0xff]  ;;  %p2499_p10 = pneg %p2498_p7 }
  0x69   : > { %1269 = vmatpush.bf16.msra.mxu2 %v2764_v8  ;;  %v316_v29 = vld [vmem:[%s2738_s11 + $0x40] sm:$0xff]  ;;  %v630_v33 = vpack.c.bf16 %v511_v27, %v504_v26  ;;  %v534_v35 = vpack.c.bf16 %v317_v31, %v310_v30  ;;  %v329_v37 = vld [vmem:[%s2738_s11 + $0xa8] sm:$0xff]  ;;  %v518_v38 = vld [vmem:[%s2738_s11 + $0x690] sm:$0xff] }
  0x6a   : > { %v533_v34 = vpack.c.bf16 %v316_v29, %v309_v28  ;;  %v525_v39 = vld [vmem:[%s2738_s11 + $0x6c8] sm:$0xff]  ;;  %v323_v40 = vld [vmem:[%s2738_s11 + $0x78] sm:$0xff]  ;;  %v330_v41 = vld [vmem:[%s2738_s11 + $0xb0] sm:$0xff]  ;;  %v539_v44 = vpack.c.bf16 %v329_v37, %v322_v36  ;;  %p2504_p5 = pnand %p2503_p3, %p2499_p10 }
  0x6b   : > { %1092 = vmatpush.bf16.msra.mxu0 %v2195_v9  ;;  %2243 = vmatpush.bf16.msra.mxu3 %v2195_v9  ;;  %v324_v42 = vld [vmem:[%s2738_s11 + $0x80] sm:$0xff]  ;;  %v331_v43 = vld [vmem:[%s2738_s11 + $0xb8] sm:$0xff]  ;;  %v637_v45 = vpack.c.bf16 %v525_v39, %v518_v38  ;;  %v540_v46 = vpack.c.bf16 %v330_v41, %v323_v40  ;;  %v337_v50 = vld [vmem:[%s2738_s11 + $0xe8] sm:$0xff] }
  0x6c   : > { %1181 = vmatpush.bf16.msra.mxu1 %v2203_v10  ;;  %v541_v47 = vpack.c.bf16 %v331_v43, %v324_v42  ;;  %v336_v48 = vld [vmem:[%s2738_s11 + $0xe0] sm:$0xff]  ;;  %v343_v49 = vld [vmem:[%s2738_s11 + $0x118] sm:$0xff]  ;;  %v505_v51 = vld [vmem:[%s2738_s11 + $0x628] sm:$0xff] }
  0x6d   : > { %1270 = vmatpush.bf16.msra.mxu2 %v2767_v11  ;;  %v512_v52 = vld [vmem:[%s2738_s11 + $0x660] sm:$0xff]  ;;  %v338_v54 = vld [vmem:[%s2738_s11 + $0xf0] sm:$0xff]  ;;  %v345_v55 = vld [vmem:[%s2738_s11 + $0x128] sm:$0xff]  ;;  %v546_v56 = vpack.c.bf16 %v343_v49, %v336_v48 }
  0x6e   : > { %v344_v53 = vld [vmem:[%s2738_s11 + $0x120] sm:$0xff]  ;;  %v631_v57 = vpack.c.bf16 %v512_v52, %v505_v51  ;;  %v548_v59 = vpack.c.bf16 %v345_v55, %v338_v54  ;;  %v2230_v61 = vld [vmem:[#allocation6 + $0x138] sm:$0xff]  ;;  %v350_v63 = vld [vmem:[%s2738_s11 + $0x150] sm:$0xff] }
  0x6f   : > { %1093 = vmatpush.bf16.msra.mxu0 %v2194_v12  ;;  %2244 = vmatpush.bf16.msra.mxu3 %v2194_v12  ;;  %v547_v58 = vpack.c.bf16 %v344_v53, %v337_v50  ;;  %v2239_v60 = vld [vmem:[#allocation6 + $0x180] sm:$0xff]  ;;  %v2238_v62 = vld [vmem:[#allocation6 + $0x178] sm:$0xff]  ;;  %v357_v0 = vld [vmem:[%s2738_s11 + $0x188] sm:$0xff] }
  0x70   : > { %1182 = vmatpush.bf16.msra.mxu1 %v2202_v13  ;;  %v526_v3 = vld [vmem:[%s2738_s11 + $0x6d0] sm:$0xff]  ;;  %v359_v6 = vld [vmem:[%s2738_s11 + $0x198] sm:$0xff]  ;;  %v364_v12 = vld [vmem:[%s2738_s11 + $0x1c0] sm:$0xff] }
  0x71   : > { %1271 = vmatpush.bf16.msra.mxu2 %v2770_v14  ;;  %v2237_v27 = vld [vmem:[#allocation6 + $0x170] sm:$0xff]  ;;  %v2219_v28 = vld [vmem:[#allocation6 + $0xe0] sm:$0xff]  ;;  %v2218_v29 = vld [vmem:[#allocation6 + $0xd8] sm:$0xff] }
  0x72   : > { %v378_v30 = vld [vmem:[%s2738_s11 + $0x230] sm:$0xff]  ;;  %v385_v31 = vld [vmem:[%s2738_s11 + $0x268] sm:$0xff]  ;;  %v380_v36 = vld [vmem:[%s2738_s11 + $0x240] sm:$0xff] }
  0x73   : > { %1094 = vmatpush.bf16.msra.mxu0 %v2193_v15  ;;  %2245 = vmatpush.bf16.msra.mxu3 %v2193_v15  ;;  %v365_v15 = vld [vmem:[%s2738_s11 + $0x1c8] sm:$0xff]  ;;  %v387_v37 = vld [vmem:[%s2738_s11 + $0x278] sm:$0xff]  ;;  %v2217_v38 = vld [vmem:[#allocation6 + $0xd0] sm:$0xff]  ;;  %v567_v39 = vpack.c.bf16 %v385_v31, %v378_v30 }
  0x74   : > { %1183 = vmatpush.bf16.msra.mxu1 %v2201_v16  ;;  %v569_v42 = vpack.c.bf16 %v387_v37, %v380_v36  ;;  %v2216_v43 = vld [vmem:[#allocation6 + $0xc8] sm:$0xff]  ;;  %v311_v48 = vld [vmem:[%s2738_s11 + $0x18] sm:$0xff]  ;;  %v318_v49 = vld [vmem:[%s2738_s11 + $0x50] sm:$0xff] }
  0x75   : > { %1272 = vmatpush.bf16.msra.mxu2 %v2773_v17  ;;  %v400_v50 = vld [vmem:[%s2738_s11 + $0x2e0] sm:$0xff]  ;;  %v394_v51 = vld [vmem:[%s2738_s11 + $0x2b0] sm:$0xff]  ;;  %v401_v52 = vld [vmem:[%s2738_s11 + $0x2e8] sm:$0xff]  ;;  %v535_v54 = vpack.c.bf16 %v318_v49, %v311_v48 }
  0x76   : > { %v353_v36 = vld [vmem:[%s2738_s11 + $0x168] sm:$0xff]  ;;  %v360_v37 = vld [vmem:[%s2738_s11 + $0x1a0] sm:$0xff] }
  0x77   : > { %1095 = vmatpush.bf16.msra.mxu0 %v2192_v18  ;;  %2246 = vmatpush.bf16.msra.mxu3 %v2192_v18  ;;  %v513_v18 = vld [vmem:[%s2738_s11 + $0x668] sm:$0xff] }
  0x78   : > { %1184 = vmatpush.bf16.msra.mxu1 %v2200_v19 }
  0x79   : > { %1273 = vmatpush.bf16.msra.mxu2 %v2776_v20 }
  0x7b   : > { %1096 = vmatpush.bf16.msra.mxu0 %v2191_v21  ;;  %2247 = vmatpush.bf16.msra.mxu3 %v2191_v21  ;;  %v366_v21 = vld [vmem:[%s2738_s11 + $0x1d0] sm:$0xff] }
  0x7c   : > { %1185 = vmatpush.bf16.msra.mxu1 %v2199_v22 }
  0x7d   : > { %1274 = vmatpush.bf16.msra.mxu2 %v2778_v23 }
  0x7e   : > { %1097 = vmatmul.bf16.vlgmr.msra.gmra.mxu0 %v532_v32  ;;  %1167 = vmatmul.bf16.vlgmr.msra.gmra.mxu3 %v630_v33  ;;  %v379_v32 = vld [vmem:[%s2738_s11 + $0x238] sm:$0xff]  ;;  %v520_v33 = vld [vmem:[%s2738_s11 + $0x6a0] sm:$0xff] }
  0x7f   : > { %2248 = vmatpush.bf16.msrb.mxu3 %v2752_v1  ;;  %1186 = vmatmul.bf16.vlgmr.msra.gmra.mxu1 %v533_v34  ;;  %v351_v1 = vld [vmem:[%s2738_s11 + $0x158] sm:$0xff] }
  0x80   : > { %1275 = vmatmul.bf16.vlgmr.msra.gmra.mxu2 %v534_v35  ;;  %1445 = vmatpush.bf16.msrb.mxu0 %v2230_v61  ;;  %v527_v34 = vld [vmem:[%s2738_s11 + $0x6d8] sm:$0xff]  ;;  %v386_v35 = vld [vmem:[%s2738_s11 + $0x270] sm:$0xff] }
  0x81   : > { %1630 = vmatpush.bf16.msrb.mxu2 %v2239_v60  ;;  %1534 = vmatpush.bf16.msrb.mxu1 %v2238_v62  ;;  %v639_v40 = vpack.c.bf16 %v527_v34, %v520_v33  ;;  %v568_v41 = vpack.c.bf16 %v386_v35, %v379_v32  ;;  %v2236_v60 = vld [vmem:[#allocation6 + $0x168] sm:$0xff]  ;;  %v407_v61 = vld [vmem:[%s2738_s11 + $0x318] sm:$0xff]  ;;  %v434_v33 = vld [vmem:[%s2738_s11 + $0x3f0] sm:$0xff] }
  0x82   : > { %v325_v62 = vld [vmem:[%s2738_s11 + $0x88] sm:$0xff]  ;;  %v435_v35 = vld [vmem:[%s2738_s11 + $0x3f8] sm:$0xff] }
  0x83   : > { %2249 = vmatpush.bf16.msrb.mxu3 %v2758_v4  ;;  %v358_v4 = vld [vmem:[%s2738_s11 + $0x190] sm:$0xff]  ;;  %v441_v34 = vld [vmem:[%s2738_s11 + $0x428] sm:$0xff] }
  0x85   : > { %1535 = vmatpush.bf16.msrb.mxu1 %v2237_v27 }
  0x87   : > { %2250 = vmatpush.bf16.msrb.mxu3 %v2204_v7  ;;  %v553_v7 = vpack.c.bf16 %v357_v0, %v350_v63  ;;  %v332_v63 = vld [vmem:[%s2738_s11 + $0xc0] sm:$0xff]  ;;  %v414_v0 = vld [vmem:[%s2738_s11 + $0x350] sm:$0xff] }
  0x89   : > { %1536 = vmatpush.bf16.msrb.mxu1 %v2236_v60  ;;  %v455_v60 = vld [vmem:[%s2738_s11 + $0x498] sm:$0xff] }
  0x8b   : > { %2251 = vmatpush.bf16.msrb.mxu3 %v2203_v10 }
  0x8e   : > { %1102 = vmatmul.bf16.gmra.mxu0 %v539_v44  ;;  %1172 = vmatmul.bf16.gmra.mxu3 %v637_v45  ;;  %v2215_v44 = vld [vmem:[#allocation6 + $0xc0] sm:$0xff] }
  0x8f   : > { %2252 = vmatpush.bf16.msrb.mxu3 %v2202_v13  ;;  %1191 = vmatmul.bf16.gmra.mxu1 %v540_v46  ;;  %v371_v13 = vld [vmem:[%s2738_s11 + $0x1f8] sm:$0xff]  ;;  %v392_v45 = vld [vmem:[%s2738_s11 + $0x2a0] sm:$0xff] }
  0x90   : > { %1280 = vmatmul.bf16.gmra.mxu2 %v541_v47  ;;  %v560_v24 = vpack.c.bf16 %v371_v13, %v364_v12  ;;  %v399_v46 = vld [vmem:[%s2738_s11 + $0x2d8] sm:$0xff]  ;;  %v393_v47 = vld [vmem:[%s2738_s11 + $0x2a8] sm:$0xff]  ;;  %v346_v12 = vld [vmem:[%s2738_s11 + $0x130] sm:$0xff] }
  0x91   : > { %v574_v53 = vpack.c.bf16 %v399_v46, %v392_v45  ;;  %v575_v55 = vpack.c.bf16 %v400_v50, %v393_v47  ;;  %v428_v13 = vld [vmem:[%s2738_s11 + $0x3c0] sm:$0xff] }
  0x93   : > { %2253 = vmatpush.bf16.msrb.mxu3 %v2201_v16  ;;  %v506_v16 = vld [vmem:[%s2738_s11 + $0x630] sm:$0xff] }
  0x94   : > { %v632_v25 = vpack.c.bf16 %v513_v18, %v506_v16  ;;  %v429_v16 = vld [vmem:[%s2738_s11 + $0x3c8] sm:$0xff] }
  0x97   : > { %2254 = vmatpush.bf16.msrb.mxu3 %v2200_v19  ;;  %v372_v19 = vld [vmem:[%s2738_s11 + $0x200] sm:$0xff] }
  0x98   : > { %v561_v26 = vpack.c.bf16 %v372_v19, %v365_v15  ;;  %v422_v15 = vld [vmem:[%s2738_s11 + $0x390] sm:$0xff] }
  0x9b   : > { %2255 = vmatpush.bf16.msrb.mxu3 %v2199_v22  ;;  %v2221_v22 = vld [vmem:[#allocation6 + $0xf0] sm:$0xff] }
  0x9e   : > { %1107 = vmatmul.bf16.gmra.mxu0 %v546_v56  ;;  %1256 = vmatmul.bf16.vlgmr.msrb.gmra.mxu3 %v631_v57  ;;  %v576_v56 = vpack.c.bf16 %v401_v52, %v394_v51  ;;  %v2228_v57 = vld [vmem:[#allocation6 + $0x128] sm:$0xff] }
  0x9f   : > { %2256 = vmatpush.bf16.msra.mxu3 %v2754_v2  ;;  %1196 = vmatmul.bf16.gmra.mxu1 %v547_v58  ;;  %v519_v2 = vld [vmem:[%s2738_s11 + $0x698] sm:$0xff]  ;;  %v406_v58 = vld [vmem:[%s2738_s11 + $0x310] sm:$0xff] }
  0xa0   : > { %1285 = vmatmul.bf16.gmra.mxu2 %v548_v59  ;;  %v638_v9 = vpack.c.bf16 %v526_v3, %v519_v2  ;;  %v413_v59 = vld [vmem:[%s2738_s11 + $0x348] sm:$0xff]  ;;  %v415_v2 = vld [vmem:[%s2738_s11 + $0x358] sm:$0xff] }
  0xa1   : > { %v581_v3 = vpack.c.bf16 %v413_v59, %v406_v58  ;;  %v448_v59 = vld [vmem:[%s2738_s11 + $0x460] sm:$0xff] }
  0xa3   : > { %2257 = vmatpush.bf16.msra.mxu3 %v2760_v5  ;;  %v352_v5 = vld [vmem:[%s2738_s11 + $0x160] sm:$0xff] }
  0xa4   : > { %v555_v10 = vpack.c.bf16 %v359_v6, %v352_v5  ;;  %v582_v5 = vpack.c.bf16 %v414_v0, %v407_v61  ;;  %v449_v61 = vld [vmem:[%s2738_s11 + $0x468] sm:$0xff]  ;;  %v456_v0 = vld [vmem:[%s2738_s11 + $0x4a0] sm:$0xff] }
  0xa7   : > { %2258 = vmatpush.bf16.msra.mxu3 %v2764_v8  ;;  %v554_v8 = vpack.c.bf16 %v358_v4, %v351_v1  ;;  %v408_v1 = vld [vmem:[%s2738_s11 + $0x320] sm:$0xff]  ;;  %v542_v4 = vpack.c.bf16 %v332_v63, %v325_v62  ;;  %v367_v62 = vld [vmem:[%s2738_s11 + $0x1d8] sm:$0xff]  ;;  %v374_v63 = vld [vmem:[%s2738_s11 + $0x210] sm:$0xff] }
  0xa8   : > { %v583_v6 = vpack.c.bf16 %v415_v2, %v408_v1  ;;  %v450_v1 = vld [vmem:[%s2738_s11 + $0x470] sm:$0xff]  ;;  %v457_v2 = vld [vmem:[%s2738_s11 + $0x4a8] sm:$0xff] }
  0xab   : > { %2259 = vmatpush.bf16.msra.mxu3 %v2767_v11  ;;  %v2222_v11 = vld [vmem:[#allocation6 + $0xf8] sm:$0xff] }
  0xae   : > { %1112 = vmatmul.bf16.gmra.mxu0 %v553_v7  ;;  %1261 = vmatmul.bf16.gmra.mxu3 %v638_v9  ;;  %v2856_v7 = vld [vmem:[#allocation8] ss:$0 sm:$0xff]  ;;  %v420_v9 = vld [vmem:[%s2738_s11 + $0x380] sm:$0xff] }
  0xaf   : > { %2260 = vmatpush.bf16.msra.mxu3 %v2770_v14  ;;  %1201 = vmatmul.bf16.gmra.mxu1 %v554_v8  ;;  %v373_v14 = vld [vmem:[%s2738_s11 + $0x208] sm:$0xff]  ;;  %v427_v8 = vld [vmem:[%s2738_s11 + $0x3b8] sm:$0xff] }
  0xb0   : > { %1290 = vmatmul.bf16.gmra.mxu2 %v555_v10  ;;  %v421_v10 = vld [vmem:[%s2738_s11 + $0x388] sm:$0xff]  ;;  %v588_v18 = vpack.c.bf16 %v427_v8, %v420_v9 }
  0xb3   : > { %2261 = vmatpush.bf16.msra.mxu3 %v2773_v17  ;;  %v562_v17 = vpack.c.bf16 %v373_v14, %v366_v21  ;;  %v589_v14 = vpack.c.bf16 %v428_v13, %v421_v10  ;;  %v603_v10 = vpack.c.bf16 %v456_v0, %v449_v61  ;;  %v2224_v0 = vld [vmem:[#allocation6 + $0x108] sm:$0xff] }
  0xb7   : > { %2262 = vmatpush.bf16.msra.mxu3 %v2776_v20  ;;  %v2220_v20 = vld [vmem:[#allocation6 + $0xe8] sm:$0xff] }
  0xbb   : > { %2263 = vmatpush.bf16.msra.mxu3 %v2778_v23  ;;  %v2229_v23 = vld [vmem:[#allocation6 + $0x130] sm:$0xff] }
  0xbc   : > { %1446 = vmatpush.bf16.msrb.mxu0 %v2229_v23 }
  0xbe   : > { %1117 = vmatmul.bf16.gmra.mxu0 %v560_v24  ;;  %1345 = vmatmul.bf16.vlgmr.msra.gmra.mxu3 %v632_v25 }
  0xbf   : > { %1356 = vmatpush.bf16.msrb.mxu3 %v2222_v11  ;;  %1206 = vmatmul.bf16.gmra.mxu1 %v561_v26  ;;  %v339_v11 = vld [vmem:[%s2738_s11 + $0xf8] sm:$0xff] }
  0xc0   : > { %1295 = vmatmul.bf16.gmra.mxu2 %v562_v17  ;;  %1447 = vmatpush.bf16.msrb.mxu0 %v2228_v57  ;;  %v549_v19 = vpack.c.bf16 %v346_v12, %v339_v11  ;;  %v2227_v17 = vld [vmem:[#allocation6 + $0x120] sm:$0xff]  ;;  %v604_v11 = vpack.c.bf16 %v457_v2, %v450_v1  ;;  %v2226_v12 = vld [vmem:[#allocation6 + $0x118] sm:$0xff]  ;;  %v2232_v1 = vld [vmem:[#allocation6 + $0x148] sm:$0xff] }
  0xc1   : > { %v477_v2 = vld [vmem:[%s2738_s11 + $0x548] sm:$0xff] }
  0xc3   : > { %1357 = vmatpush.bf16.msrb.mxu3 %v2221_v22  ;;  %v590_v22 = vpack.c.bf16 %v429_v16, %v422_v15 }
  0xc4   : > { %1448 = vmatpush.bf16.msrb.mxu0 %v2227_v17 }
  0xc7   : > { %1358 = vmatpush.bf16.msrb.mxu3 %v2220_v20  ;;  %v2235_v20 = vld [vmem:[#allocation6 + $0x160] sm:$0xff] }
  0xc8   : > { %1537 = vmatpush.bf16.msrb.mxu1 %v2235_v20  ;;  %1449 = vmatpush.bf16.msrb.mxu0 %v2226_v12 }
  0xcb   : > { %1359 = vmatpush.bf16.msrb.mxu3 %v2219_v28 }
  0xce   : > { %1122 = vmatmul.bf16.gmra.mxu0 %v567_v39  ;;  %1350 = vmatmul.bf16.gmra.mxu3 %v639_v40  ;;  %v436_v39 = vld [vmem:[%s2738_s11 + $0x400] sm:$0xff]  ;;  %v443_v40 = vld [vmem:[%s2738_s11 + $0x438] sm:$0xff] }
  0xcf   : > { %1360 = vmatpush.bf16.msrb.mxu3 %v2218_v29  ;;  %1211 = vmatmul.bf16.gmra.mxu1 %v568_v41  ;;  %v597_v48 = vpack.c.bf16 %v443_v40, %v436_v39 }
  0xd0   : > { %1300 = vmatmul.bf16.gmra.mxu2 %v569_v42 }
  0xd3   : > { %1361 = vmatpush.bf16.msrb.mxu3 %v2217_v38  ;;  %v442_v38 = vld [vmem:[%s2738_s11 + $0x430] sm:$0xff] }
  0xd4   : > { %v596_v47 = vpack.c.bf16 %v442_v38, %v435_v35  ;;  %v471_v35 = vld [vmem:[%s2738_s11 + $0x518] sm:$0xff] }
  0xd7   : > { %1362 = vmatpush.bf16.msrb.mxu3 %v2216_v43  ;;  %v595_v43 = vpack.c.bf16 %v441_v34, %v434_v33  ;;  %v470_v33 = vld [vmem:[%s2738_s11 + $0x510] sm:$0xff]  ;;  %v464_v34 = vld [vmem:[%s2738_s11 + $0x4e0] sm:$0xff] }
  0xdb   : > { %1363 = vmatpush.bf16.msrb.mxu3 %v2215_v44  ;;  %v556_v44 = vpack.c.bf16 %v360_v37, %v353_v36 }
  0xde   : > { %1127 = vmatmul.bf16.gmra.mxu0 %v574_v53  ;;  %1364 = vmatmul.bf16.vlgmr.msrb.gmra.mxu3 %v535_v54 }
  0xdf   : > { %1216 = vmatmul.bf16.gmra.mxu1 %v575_v55 }
  0xe0   : > { %1305 = vmatmul.bf16.gmra.mxu2 %v576_v56 }
  0xee   : > { %1132 = vmatmul.bf16.gmra.mxu0 %v581_v3  ;;  %1369 = vmatmul.bf16.gmra.mxu3 %v542_v4 }
  0xef   : > { %1221 = vmatmul.bf16.gmra.mxu1 %v582_v5  ;;  %v602_v5 = vpack.c.bf16 %v455_v60, %v448_v59  ;;  %v476_v60 = vld [vmem:[%s2738_s11 + $0x540] sm:$0xff] }
  0xf0   : > { %1310 = vmatmul.bf16.gmra.mxu2 %v583_v6  ;;  %v563_v6 = vpack.c.bf16 %v374_v63, %v367_v62  ;;  %v483_v63 = vld [vmem:[%s2738_s11 + $0x578] sm:$0xff] }
  0xfb   : > { %v1098_v21 = vpop.f32.mrf.mxu0 }
  0xfc   : > { %v1099_v24 = vadd.f32 %v2856_v7, %v1098_v21  ;;  %v1187_v25 = vpop.f32.mrf.mxu1 }
  0xfe   : > { %v1188_v26 = vadd.f32 %v1187_v25, %v1099_v24  ;;  %1137 = vmatmul.bf16.gmra.mxu0 %v588_v18  ;;  %1374 = vmatmul.bf16.gmra.mxu3 %v549_v19  ;;  %v2234_v19 = vld [vmem:[#allocation6 + $0x158] sm:$0xff] }
  0xff   : > { %1226 = vmatmul.bf16.gmra.mxu1 %v589_v14 }
 0x100   : > { %1315 = vmatmul.bf16.gmra.mxu2 %v590_v22  ;;  %1538 = vmatpush.bf16.msrb.mxu1 %v2234_v19 }
 0x101   : > { %v1168_v23 = vpop.f32.mrf.mxu3 }
 0x102   : > { %v1169_v16 = vadd.f32 %v2856_v7, %v1168_v23 }
 0x103   : > { %v1276_v27 = vpop.f32.mrf.mxu2  ;;  %v1100_v29 = vpop.f32.mrf.mxu0 }
 0x104   : > { %v2867_v28 = vadd.f32 %v1276_v27, %v1188_v26  ;;  %v1101_v30 = vadd.f32 %v2856_v7, %v1100_v29  ;;  %v1189_v31 = vpop.f32.mrf.mxu1  ;;  %v462_v27 = vld [vmem:[%s2738_s11 + $0x4d0] sm:$0xff]  ;;  %v469_v29 = vld [vmem:[%s2738_s11 + $0x508] sm:$0xff] }
 0x105   : > { %v609_v39 = vpack.c.bf16 %v469_v29, %v462_v27 }
 0x106   : > { %v1190_v32 = vadd.f32 %v1189_v31, %v1101_v30  ;;  %v463_v30 = vld [vmem:[%s2738_s11 + $0x4d8] sm:$0xff]  ;;  %v381_v31 = vld [vmem:[%s2738_s11 + $0x248] sm:$0xff] }
 0x109   : > { %v1170_v41 = vpop.f32.mrf.mxu3 }
 0x10a   : > { %v1171_v20 = vadd.f32 %v2856_v7, %v1170_v41  ;;  %v611_v41 = vpack.c.bf16 %v471_v35, %v464_v34  ;;  %v490_v35 = vld [vmem:[%s2738_s11 + $0x5b0] sm:$0xff] }
 0x10b   : > { %v1278_v42 = vpop.f32.mrf.mxu2  ;;  %v1103_v46 = vpop.f32.mrf.mxu0 }
 0x10c   : > { %v2878_v45 = vadd.f32 %v1278_v42, %v1190_v32  ;;  %v1104_v49 = vadd.f32 %v2856_v7, %v1103_v46  ;;  %v1192_v50 = vpop.f32.mrf.mxu1  ;;  %v388_v32 = vld [vmem:[%s2738_s11 + $0x280] sm:$0xff] }
 0x10d   : > { %v570_v40 = vpack.c.bf16 %v388_v32, %v381_v31 }
 0x10e   : > { %v1193_v51 = vadd.f32 %v1192_v50, %v1104_v49  ;;  %1142 = vmatmul.bf16.gmra.mxu0 %v595_v43  ;;  %1379 = vmatmul.bf16.gmra.mxu3 %v556_v44  ;;  %v610_v44 = vpack.c.bf16 %v470_v33, %v463_v30 }
 0x10f   : > { %1231 = vmatmul.bf16.gmra.mxu1 %v596_v47 }
 0x110   : > { %1320 = vmatmul.bf16.gmra.mxu2 %v597_v48 }
 0x111   : > { %v2881_v52 = vpop.f32.mrf.mxu3 }
 0x112   : > { %v1174_v48 = vadd.f32 %v2856_v7, %v2881_v52 }
 0x113   : > { %v1281_v53 = vpop.f32.mrf.mxu2  ;;  %v1105_v55 = vpop.f32.mrf.mxu0 }
 0x114   : > { %v2883_v54 = vadd.f32 %v1281_v53, %v1193_v51  ;;  %v1106_v56 = vadd.f32 %v2856_v7, %v1105_v55  ;;  %v1194_v57 = vpop.f32.mrf.mxu1  ;;  %v2225_v55 = vld [vmem:[#allocation6 + $0x110] sm:$0xff] }
 0x115   : > { %1450 = vmatpush.bf16.msrb.mxu0 %v2225_v55 }
 0x116   : > { %v1195_v58 = vadd.f32 %v1194_v57, %v1106_v56  ;;  %v2233_v56 = vld [vmem:[#allocation6 + $0x150] sm:$0xff] }
 0x117   : > { %1539 = vmatpush.bf16.msrb.mxu1 %v2233_v56 }
 0x119   : > { %v2894_v3 = vpop.f32.mrf.mxu3  ;;  %1451 = vmatpush.bf16.msrb.mxu0 %v2224_v0 }
 0x11a   : > { %v1176_v61 = vadd.f32 %v2856_v7, %v2894_v3  ;;  %v2231_v3 = vld [vmem:[#allocation6 + $0x140] sm:$0xff] }
 0x11b   : > { %v1283_v4 = vpop.f32.mrf.mxu2  ;;  %v1108_v8 = vpop.f32.mrf.mxu0  ;;  %1540 = vmatpush.bf16.msrb.mxu1 %v2232_v1 }
 0x11c   : > { %v2896_v9 = vadd.f32 %v1283_v4, %v1195_v58  ;;  %v1109_v13 = vadd.f32 %v2856_v7, %v1108_v8  ;;  %v1197_v15 = vpop.f32.mrf.mxu1  ;;  %v395_v4 = vld [vmem:[%s2738_s11 + $0x2b8] sm:$0xff]  ;;  %v478_v8 = vld [vmem:[%s2738_s11 + $0x550] sm:$0xff] }
 0x11e   : > { %v1198_v18 = vadd.f32 %v1197_v15, %v1109_v13  ;;  %1147 = vmatmul.bf16.gmra.mxu0 %v602_v5  ;;  %1384 = vmatmul.bf16.gmra.mxu3 %v563_v6  ;;  %v402_v5 = vld [vmem:[%s2738_s11 + $0x2f0] sm:$0xff]  ;;  %v484_v6 = vld [vmem:[%s2738_s11 + $0x580] sm:$0xff]  ;;  %v616_v15 = vpack.c.bf16 %v483_v63, %v476_v60 }
 0x11f   : > { %1236 = vmatmul.bf16.gmra.mxu1 %v603_v10  ;;  %v485_v10 = vld [vmem:[%s2738_s11 + $0x588] sm:$0xff] }
 0x120   : > { %1325 = vmatmul.bf16.gmra.mxu2 %v604_v11  ;;  %1541 = vmatpush.bf16.msrb.mxu1 %v2231_v3 }
 0x121   : > { %v1257_v21 = vpop.f32.mrf.mxu3 }
 0x122   : > { %v2900_v14 = vadd.f32 %v1257_v21, %v1169_v16  ;;  %v577_v16 = vpack.c.bf16 %v402_v5, %v395_v4  ;;  %v423_v4 = vld [vmem:[%s2738_s11 + $0x398] sm:$0xff]  ;;  %v430_v5 = vld [vmem:[%s2738_s11 + $0x3d0] sm:$0xff] }
 0x123   : > { %v1286_v22 = vpop.f32.mrf.mxu2  ;;  %v1110_v25 = vpop.f32.mrf.mxu0  ;;  %v591_v3 = vpack.c.bf16 %v430_v5, %v423_v4 }
 0x124   : > { %v2902_v24 = vadd.f32 %v1286_v22, %v1198_v18  ;;  %v1111_v26 = vadd.f32 %v2856_v7, %v1110_v25  ;;  %v1199_v17 = vpop.f32.mrf.mxu1  ;;  %v2223_v18 = vld [vmem:[#allocation6 + $0x100] sm:$0xff]  ;;  %v617_v22 = vpack.c.bf16 %v484_v6, %v477_v2  ;;  %v618_v25 = vpack.c.bf16 %v485_v10, %v478_v8  ;;  %v319_v8 = vld [vmem:[%s2738_s11 + $0x58] sm:$0xff]  ;;  %v313_v10 = vld [vmem:[%s2738_s11 + $0x28] sm:$0xff] }
 0x125   : > { %1452 = vmatpush.bf16.msrb.mxu0 %v2223_v18  ;;  %v312_v6 = vld [vmem:[%s2738_s11 + $0x20] sm:$0xff] }
 0x126   : > { %v1200_v23 = vadd.f32 %v1199_v17, %v1111_v26 }
 0x129   : > { %v1259_v36 = vpop.f32.mrf.mxu3 }
 0x12a   : > { %v2914_v37 = vadd.f32 %v1259_v36, %v1171_v20  ;;  %v497_v36 = vld [vmem:[%s2738_s11 + $0x5e8] sm:$0xff] }
 0x12b   : > { %v1288_v38 = vpop.f32.mrf.mxu2  ;;  %v1113_v43 = vpop.f32.mrf.mxu0 }
 0x12c   : > { %v2916_v42 = vadd.f32 %v1288_v38, %v1200_v23  ;;  %v1114_v46 = vadd.f32 %v2856_v7, %v1113_v43  ;;  %v1202_v47 = vpop.f32.mrf.mxu1  ;;  %v491_v38 = vld [vmem:[%s2738_s11 + $0x5b8] sm:$0xff]  ;;  %v498_v43 = vld [vmem:[%s2738_s11 + $0x5f0] sm:$0xff] }
 0x12d   : > { %v624_v55 = vpack.c.bf16 %v498_v43, %v491_v38  ;;  %v326_v43 = vld [vmem:[%s2738_s11 + $0x90] sm:$0xff] }
 0x12e   : > { %v1203_v49 = vadd.f32 %v1202_v47, %v1114_v46  ;;  %1152 = vmatmul.bf16.gmra.mxu0 %v609_v39  ;;  %1389 = vmatmul.bf16.gmra.mxu3 %v570_v40  ;;  %v409_v39 = vld [vmem:[%s2738_s11 + $0x328] sm:$0xff]  ;;  %v416_v40 = vld [vmem:[%s2738_s11 + $0x360] sm:$0xff] }
 0x12f   : > { %1241 = vmatmul.bf16.gmra.mxu1 %v610_v44  ;;  %v492_v44 = vld [vmem:[%s2738_s11 + $0x5c0] sm:$0xff] }
 0x130   : > { %1330 = vmatmul.bf16.gmra.mxu2 %v611_v41  ;;  %v499_v41 = vld [vmem:[%s2738_s11 + $0x5f8] sm:$0xff] }
 0x131   : > { %v1262_v50 = vpop.f32.mrf.mxu3  ;;  %v625_v56 = vpack.c.bf16 %v499_v41, %v492_v44  ;;  %v333_v44 = vld [vmem:[%s2738_s11 + $0xc8] sm:$0xff]  ;;  %v327_v41 = vld [vmem:[%s2738_s11 + $0x98] sm:$0xff] }
 0x132   : > { %v2921_v51 = vadd.f32 %v1262_v50, %v1174_v48  ;;  %v623_v48 = vpack.c.bf16 %v497_v36, %v490_v35 }
 0x133   : > { %v1291_v53 = vpop.f32.mrf.mxu2  ;;  %v1115_v52 = vpop.f32.mrf.mxu0 }
 0x134   : > { %v2923_v57 = vadd.f32 %v1291_v53, %v1203_v49  ;;  %v1116_v58 = vadd.f32 %v2856_v7, %v1115_v52  ;;  %v1204_v59 = vpop.f32.mrf.mxu1  ;;  %v584_v49 = vpack.c.bf16 %v416_v40, %v409_v39  ;;  %v437_v39 = vld [vmem:[%s2738_s11 + $0x408] sm:$0xff]  ;;  %v444_v40 = vld [vmem:[%s2738_s11 + $0x440] sm:$0xff] }
 0x136   : > { %v1205_v62 = vadd.f32 %v1204_v59, %v1116_v58 }
 0x139   : > { %v1264_v11 = vpop.f32.mrf.mxu3 }
 0x13a   : > { %v2936_v12 = vadd.f32 %v1264_v11, %v1176_v61  ;;  %v320_v11 = vld [vmem:[%s2738_s11 + $0x60] sm:$0xff] }
 0x13b   : > { %v1293_v13 = vpop.f32.mrf.mxu2  ;;  %v1118_v21 = vpop.f32.mrf.mxu0 }
 0x13c   : > { %v2938_v19 = vadd.f32 %v1293_v13, %v1205_v62  ;;  %v1119_v26 = vadd.f32 %v2856_v7, %v1118_v21  ;;  %v1207_v17 = vpop.f32.mrf.mxu1  ;;  %v314_v13 = vld [vmem:[%s2738_s11 + $0x30] sm:$0xff]  ;;  %v536_v21 = vpack.c.bf16 %v319_v8, %v312_v6 }
 0x13e   : > { %v1208_v20 = vadd.f32 %v1207_v17, %v1119_v26  ;;  %1157 = vmatmul.bf16.gmra.mxu0 %v616_v15  ;;  %1394 = vmatmul.bf16.gmra.mxu3 %v577_v16  ;;  %v321_v15 = vld [vmem:[%s2738_s11 + $0x68] sm:$0xff]  ;;  %v537_v26 = vpack.c.bf16 %v320_v11, %v313_v10  ;;  %v451_v11 = vld [vmem:[%s2738_s11 + $0x478] sm:$0xff] }
 0x13f   : > { %1246 = vmatmul.bf16.gmra.mxu1 %v617_v22  ;;  %v538_v17 = vpack.c.bf16 %v321_v15, %v314_v13  ;;  %v458_v13 = vld [vmem:[%s2738_s11 + $0x4b0] sm:$0xff]  ;;  %v340_v15 = vld [vmem:[%s2738_s11 + $0x100] sm:$0xff] }
 0x140   : > { %1335 = vmatmul.bf16.gmra.mxu2 %v618_v25 }
 0x141   : > { %v1346_v23 = vpop.f32.mrf.mxu3 }
 0x142   : > { %v2942_v29 = vadd.f32 %v1346_v23, %v2900_v14 }
 0x143   : > { %v1296_v27 = vpop.f32.mrf.mxu2  ;;  %v1120_v31 = vpop.f32.mrf.mxu0 }
 0x144   : > { %3383 = vst [vmem:[#allocation16_spill] sm:$0xff] %v2942_v29  ;;  %v2944_v30 = vadd.f32 %v1296_v27, %v1208_v20  ;;  %v1121_v32 = vadd.f32 %v2856_v7, %v1120_v31  ;;  %v1209_v33 = vpop.f32.mrf.mxu1 }
 0x146   : > { %v1210_v34 = vadd.f32 %v1209_v33, %v1121_v32 }
 0x149   : > { %v1348_v46 = vpop.f32.mrf.mxu3 }
 0x14a   : > { %v2956_v14 = vadd.f32 %v1348_v46, %v2914_v37  ;;  %v334_v46 = vld [vmem:[%s2738_s11 + $0xd0] sm:$0xff] }
 0x14b   : > { %v1298_v47 = vpop.f32.mrf.mxu2  ;;  %v1123_v53 = vpop.f32.mrf.mxu0 }
 0x14c   : > { %3384 = vst [vmem:[#allocation17_spill] sm:$0xff] %v2956_v14  ;;  %v2958_v50 = vadd.f32 %v1298_v47, %v1210_v34  ;;  %v1124_v52 = vadd.f32 %v2856_v7, %v1123_v53  ;;  %v1212_v58 = vpop.f32.mrf.mxu1  ;;  %v328_v47 = vld [vmem:[%s2738_s11 + $0xa0] sm:$0xff] }
 0x14e   : > { %v1213_v59 = vadd.f32 %v1212_v58, %v1124_v52  ;;  %1162 = vmatmul.bf16.gmra.mxu0 %v623_v48  ;;  %1399 = vmatmul.bf16.gmra.mxu3 %v584_v49  ;;  %v335_v48 = vld [vmem:[%s2738_s11 + $0xd8] sm:$0xff] }
 0x14f   : > { %1251 = vmatmul.bf16.gmra.mxu1 %v624_v55  ;;  %v598_v55 = vpack.c.bf16 %v444_v40, %v437_v39 }
 0x150   : > { %1340 = vmatmul.bf16.gmra.mxu2 %v625_v56  ;;  %v543_v56 = vpack.c.bf16 %v333_v44, %v326_v43 }
 0x151   : > { %v1351_v37 = vpop.f32.mrf.mxu3 }
 0x152   : > { %v2962_v61 = vadd.f32 %v1351_v37, %v2921_v51  ;;  %v545_v37 = vpack.c.bf16 %v335_v48, %v328_v47  ;;  %v465_v48 = vld [vmem:[%s2738_s11 + $0x4e8] sm:$0xff] }
 0x153   : > { %v1301_v60 = vpop.f32.mrf.mxu2  ;;  %v1125_v63 = vpop.f32.mrf.mxu0 }
 0x154   : > { %3385 = vst [vmem:[#allocation18_spill] sm:$0xff] %v2962_v61  ;;  %v2964_v62 = vadd.f32 %v1301_v60, %v1213_v59  ;;  %v1126_v0 = vadd.f32 %v2856_v7, %v1125_v63  ;;  %v1214_v1 = vpop.f32.mrf.mxu1  ;;  %v544_v59 = vpack.c.bf16 %v334_v46, %v327_v41 }
 0x156   : > { %v1215_v2 = vadd.f32 %v1214_v1, %v1126_v0 }
 0x159   : > { %v1353_v16 = vpop.f32.mrf.mxu3 }
 0x15a   : > { %v2976_v51 = vadd.f32 %v1353_v16, %v2936_v12  ;;  %v347_v16 = vld [vmem:[%s2738_s11 + $0x138] sm:$0xff] }
 0x15b   : > { %v1303_v18 = vpop.f32.mrf.mxu2  ;;  %v1128_v25 = vpop.f32.mrf.mxu0 }
 0x15c   : > { %v2978_v22 = vadd.f32 %v1303_v18, %v1215_v2  ;;  %v1129_v20 = vadd.f32 %v2856_v7, %v1128_v25  ;;  %v1217_v23 = vpop.f32.mrf.mxu1  ;;  %v341_v18 = vld [vmem:[%s2738_s11 + $0x108] sm:$0xff] }
 0x15d   : > { %v349_v25 = vld [vmem:[%s2738_s11 + $0x148] sm:$0xff] }
 0x15e   : > { %v1218_v27 = vadd.f32 %v1217_v23, %v1129_v20  ;;  %1404 = vmatmul.bf16.gmra.mxu3 %v591_v3  ;;  %1453 = vmatmul.bf16.vlgmr.msrb.gmra.mxu0 %v536_v21  ;;  %v348_v3 = vld [vmem:[%s2738_s11 + $0x140] sm:$0xff]  ;;  %v342_v21 = vld [vmem:[%s2738_s11 + $0x110] sm:$0xff]  ;;  %v605_v20 = vpack.c.bf16 %v458_v13, %v451_v11  ;;  %v550_v23 = vpack.c.bf16 %v347_v16, %v340_v15 }
 0x15f   : > { %1542 = vmatmul.bf16.vlgmr.msrb.gmra.mxu1 %v537_v26 }
 0x160   : > { %2171 = vmatmul.msk.bf16.vlgmr.msrb.gmra.mxu2 %vm1040_vm0, %v538_v17 }
 0x161   : > { %v1365_v12 = vpop.f32.mrf.mxu3 }
 0x162   : > { %v2983_v32 = vadd.f32 %v1365_v12, %v2867_v28 }
 0x163   : > { %v1306_v31 = vpop.f32.mrf.mxu2  ;;  %v1130_v34 = vpop.f32.mrf.mxu0 }
 0x164   : > { %v2985_v33 = vadd.f32 %v1306_v31, %v1218_v27  ;;  %v1131_v35 = vadd.f32 %v2856_v7, %v1130_v34  ;;  %v1219_v36 = vpop.f32.mrf.mxu1  ;;  %v551_v31 = vpack.c.bf16 %v348_v3, %v341_v18  ;;  %v552_v34 = vpack.c.bf16 %v349_v25, %v342_v21 }
 0x166   : > { %v1220_v38 = vadd.f32 %v1219_v36, %v1131_v35 }
 0x169   : > { %v1367_v49 = vpop.f32.mrf.mxu3 }
 0x16a   : > { %v2997_v28 = vadd.f32 %v1367_v49, %v2878_v45  ;;  %v472_v49 = vld [vmem:[%s2738_s11 + $0x520] sm:$0xff] }
 0x16b   : > { %v1308_v53 = vpop.f32.mrf.mxu2  ;;  %v1133_v58 = vpop.f32.mrf.mxu0 }
 0x16c   : > { %v2999_v52 = vadd.f32 %v1308_v53, %v1220_v38  ;;  %v1134_v60 = vadd.f32 %v2856_v7, %v1133_v58  ;;  %v1222_v63 = vpop.f32.mrf.mxu1  ;;  %v354_v53 = vld [vmem:[%s2738_s11 + $0x170] sm:$0xff] }
 0x16d   : > { %v362_v58 = vld [vmem:[%s2738_s11 + $0x1b0] sm:$0xff] }
 0x16e   : > { %v1223_v0 = vadd.f32 %v1222_v63, %v1134_v60  ;;  %1409 = vmatmul.bf16.gmra.mxu3 %v598_v55  ;;  %1458 = vmatmul.bf16.gmra.mxu0 %v543_v56  ;;  %v361_v55 = vld [vmem:[%s2738_s11 + $0x1a8] sm:$0xff]  ;;  %v355_v56 = vld [vmem:[%s2738_s11 + $0x178] sm:$0xff] }
 0x16f   : > { %1547 = vmatmul.bf16.gmra.mxu1 %v544_v59  ;;  %v356_v59 = vld [vmem:[%s2738_s11 + $0x180] sm:$0xff] }
 0x170   : > { %2172 = vmatmul.msk.bf16.gmra.mxu2 %vm1040_vm0, %v545_v37  ;;  %v363_v37 = vld [vmem:[%s2738_s11 + $0x1b8] sm:$0xff] }
 0x171   : > { %v1370_v45 = vpop.f32.mrf.mxu3 }
 0x172   : > { %v3004_v2 = vadd.f32 %v1370_v45, %v2883_v54  ;;  %v557_v45 = vpack.c.bf16 %v361_v55, %v354_v53 }
 0x173   : > { %v1311_v1 = vpop.f32.mrf.mxu2  ;;  %v1135_v5 = vpop.f32.mrf.mxu0 }
 0x174   : > { %v3006_v4 = vadd.f32 %v1311_v1, %v1223_v0  ;;  %v1136_v6 = vadd.f32 %v2856_v7, %v1135_v5  ;;  %v1224_v8 = vpop.f32.mrf.mxu1  ;;  %v612_v0 = vpack.c.bf16 %v472_v49, %v465_v48 }
 0x176   : > { %v1225_v10 = vadd.f32 %v1224_v8, %v1136_v6  ;;  %v558_v6 = vpack.c.bf16 %v362_v58, %v355_v56  ;;  %v559_v8 = vpack.c.bf16 %v363_v37, %v356_v59 }
 0x179   : > { %v1372_v26 = vpop.f32.mrf.mxu3 }
 0x17a   : > { %v3018_v54 = vadd.f32 %v1372_v26, %v2896_v9 }
 0x17b   : > { %v1313_v17 = vpop.f32.mrf.mxu2  ;;  %v1138_v12 = vpop.f32.mrf.mxu0 }
 0x17c   : > { %v3020_v27 = vadd.f32 %v1313_v17, %v1225_v10  ;;  %v1139_v35 = vadd.f32 %v2856_v7, %v1138_v12  ;;  %v1227_v36 = vpop.f32.mrf.mxu1  ;;  %v479_v17 = vld [vmem:[%s2738_s11 + $0x558] sm:$0xff] }
 0x17d   : > { %v375_v12 = vld [vmem:[%s2738_s11 + $0x218] sm:$0xff] }
 0x17e   : > { %v1228_v38 = vadd.f32 %v1227_v36, %v1139_v35  ;;  %1414 = vmatmul.bf16.gmra.mxu3 %v605_v20  ;;  %1463 = vmatmul.bf16.gmra.mxu0 %v550_v23  ;;  %v486_v20 = vld [vmem:[%s2738_s11 + $0x590] sm:$0xff]  ;;  %v368_v23 = vld [vmem:[%s2738_s11 + $0x1e0] sm:$0xff]  ;;  %v377_v36 = vld [vmem:[%s2738_s11 + $0x228] sm:$0xff] }
 0x17f   : > { %1552 = vmatmul.bf16.gmra.mxu1 %v551_v31  ;;  %v369_v31 = vld [vmem:[%s2738_s11 + $0x1e8] sm:$0xff]  ;;  %v370_v35 = vld [vmem:[%s2738_s11 + $0x1f0] sm:$0xff] }
 0x180   : > { %2173 = vmatmul.msk.bf16.gmra.mxu2 %vm1040_vm0, %v552_v34  ;;  %v376_v34 = vld [vmem:[%s2738_s11 + $0x220] sm:$0xff]  ;;  %v566_v48 = vpack.c.bf16 %v377_v36, %v370_v35 }
 0x181   : > { %v1375_v9 = vpop.f32.mrf.mxu3 }
 0x182   : > { %v3025_v40 = vadd.f32 %v1375_v9, %v2902_v24 }
 0x183   : > { %v1316_v39 = vpop.f32.mrf.mxu2  ;;  %v1140_v44 = vpop.f32.mrf.mxu0 }
 0x184   : > { %v3027_v43 = vadd.f32 %v1316_v39, %v1228_v38  ;;  %v1141_v41 = vadd.f32 %v2856_v7, %v1140_v44  ;;  %v1229_v46 = vpop.f32.mrf.mxu1  ;;  %v619_v39 = vpack.c.bf16 %v486_v20, %v479_v17  ;;  %v564_v44 = vpack.c.bf16 %v375_v12, %v368_v23 }
 0x186   : > { %v1230_v47 = vadd.f32 %v1229_v46, %v1141_v41 }
 0x189   : > { %v1377_v60 = vpop.f32.mrf.mxu3 }
 0x18a   : > { %v3039_v24 = vadd.f32 %v1377_v60, %v2916_v42 }
 0x18b   : > { %v1318_v63 = vpop.f32.mrf.mxu2  ;;  %v1143_v5 = vpop.f32.mrf.mxu0 }
 0x18c   : > { %v3041_v1 = vadd.f32 %v1318_v63, %v1230_v47  ;;  %v1144_v10 = vadd.f32 %v2856_v7, %v1143_v5  ;;  %v1232_v11 = vpop.f32.mrf.mxu1  ;;  %v565_v47 = vpack.c.bf16 %v376_v34, %v369_v31  ;;  %v382_v5 = vld [vmem:[%s2738_s11 + $0x250] sm:$0xff] }
 0x18e   : > { %v1233_v13 = vadd.f32 %v1232_v11, %v1144_v10  ;;  %1419 = vmatmul.bf16.gmra.mxu3 %v612_v0  ;;  %1468 = vmatmul.bf16.gmra.mxu0 %v557_v45  ;;  %v493_v0 = vld [vmem:[%s2738_s11 + $0x5c8] sm:$0xff]  ;;  %v500_v45 = vld [vmem:[%s2738_s11 + $0x600] sm:$0xff]  ;;  %v390_v10 = vld [vmem:[%s2738_s11 + $0x290] sm:$0xff] }
 0x18f   : > { %1557 = vmatmul.bf16.gmra.mxu1 %v558_v6  ;;  %v389_v6 = vld [vmem:[%s2738_s11 + $0x288] sm:$0xff]  ;;  %v384_v11 = vld [vmem:[%s2738_s11 + $0x260] sm:$0xff] }
 0x190   : > { %2174 = vmatmul.msk.bf16.gmra.mxu2 %vm1040_vm0, %v559_v8  ;;  %v383_v8 = vld [vmem:[%s2738_s11 + $0x258] sm:$0xff] }
 0x191   : > { %v1380_v42 = vpop.f32.mrf.mxu3  ;;  %v572_v17 = vpack.c.bf16 %v390_v10, %v383_v8 }
 0x192   : > { %v3046_v16 = vadd.f32 %v1380_v42, %v2923_v57 }
 0x193   : > { %v1321_v15 = vpop.f32.mrf.mxu2  ;;  %v1145_v3 = vpop.f32.mrf.mxu0 }
 0x194   : > { %v3048_v18 = vadd.f32 %v1321_v15, %v1233_v13  ;;  %v1146_v21 = vadd.f32 %v2856_v7, %v1145_v3  ;;  %v1234_v25 = vpop.f32.mrf.mxu1  ;;  %v391_v13 = vld [vmem:[%s2738_s11 + $0x298] sm:$0xff]  ;;  %v626_v3 = vpack.c.bf16 %v500_v45, %v493_v0 }
 0x195   : > { %v573_v20 = vpack.c.bf16 %v391_v13, %v384_v11 }
 0x196   : > { %v1235_v26 = vadd.f32 %v1234_v25, %v1146_v21  ;;  %v571_v21 = vpack.c.bf16 %v389_v6, %v382_v5 }
 0x199   : > { %v1382_v38 = vpop.f32.mrf.mxu3 }
 0x19a   : > { %v3060_v57 = vadd.f32 %v1382_v38, %v2938_v19 }
 0x19b   : > { %v1323_v9 = vpop.f32.mrf.mxu2  ;;  %v1148_v46 = vpop.f32.mrf.mxu0 }
 0x19c   : > { %v3062_v41 = vadd.f32 %v1323_v9, %v1235_v26  ;;  %v1149_v49 = vadd.f32 %v2856_v7, %v1148_v46  ;;  %v1237_v53 = vpop.f32.mrf.mxu1  ;;  %v507_v46 = vld [vmem:[%s2738_s11 + $0x638] sm:$0xff] }
 0x19e   : > { %v1238_v55 = vadd.f32 %v1237_v53, %v1149_v49  ;;  %1424 = vmatmul.bf16.gmra.mxu3 %v619_v39  ;;  %1473 = vmatmul.bf16.gmra.mxu0 %v564_v44  ;;  %v403_v49 = vld [vmem:[%s2738_s11 + $0x2f8] sm:$0xff]  ;;  %v397_v53 = vld [vmem:[%s2738_s11 + $0x2c8] sm:$0xff] }
 0x19f   : > { %1562 = vmatmul.bf16.gmra.mxu1 %v565_v47  ;;  %v514_v47 = vld [vmem:[%s2738_s11 + $0x670] sm:$0xff] }
 0x1a0   : > { %2175 = vmatmul.msk.bf16.gmra.mxu2 %vm1040_vm0, %v566_v48  ;;  %v396_v48 = vld [vmem:[%s2738_s11 + $0x2c0] sm:$0xff] }
 0x1a1   : > { %v3066_v19 = vpop.f32.mrf.mxu3  ;;  %v578_v0 = vpack.c.bf16 %v403_v49, %v396_v48 }
 0x1a3   : > { %v1326_v56 = vpop.f32.mrf.mxu2  ;;  %v1150_v59 = vpop.f32.mrf.mxu0 }
 0x1a4   : > { %v3068_v58 = vadd.f32 %v1326_v56, %v1238_v55  ;;  %v1151_v37 = vadd.f32 %v2856_v7, %v1150_v59  ;;  %v1239_v60 = vpop.f32.mrf.mxu1  ;;  %v404_v55 = vld [vmem:[%s2738_s11 + $0x300] sm:$0xff]  ;;  %v398_v56 = vld [vmem:[%s2738_s11 + $0x2d0] sm:$0xff]  ;;  %v405_v59 = vld [vmem:[%s2738_s11 + $0x308] sm:$0xff] }
 0x1a5   : > { %v579_v6 = vpack.c.bf16 %v404_v55, %v397_v53  ;;  %v580_v8 = vpack.c.bf16 %v405_v59, %v398_v56 }
 0x1a6   : > { %v1240_v63 = vadd.f32 %v1239_v60, %v1151_v37 }
 0x1a9   : > { %v3079_v42 = vpop.f32.mrf.mxu3 }
 0x1ab   : > { %v1328_v15 = vpop.f32.mrf.mxu2  ;;  %v1153_v26 = vpop.f32.mrf.mxu0 }
 0x1ac   : > { %v3081_v25 = vadd.f32 %v1328_v15, %v1240_v63  ;;  %v1154_v23 = vadd.f32 %v2856_v7, %v1153_v26  ;;  %v1242_v12 = vpop.f32.mrf.mxu1  ;;  %v633_v63 = vpack.c.bf16 %v514_v47, %v507_v46  ;;  %v419_v46 = vld [vmem:[%s2738_s11 + $0x378] sm:$0xff] }
 0x1ae   : > { %v1243_v31 = vadd.f32 %v1242_v12, %v1154_v23  ;;  %1429 = vmatmul.bf16.gmra.mxu3 %v626_v3  ;;  %1478 = vmatmul.bf16.gmra.mxu0 %v571_v21  ;;  %v521_v12 = vld [vmem:[%s2738_s11 + $0x6a8] sm:$0xff] }
 0x1af   : > { %1567 = vmatmul.bf16.gmra.mxu1 %v572_v17 }
 0x1b0   : > { %2176 = vmatmul.msk.bf16.gmra.mxu2 %vm1040_vm0, %v573_v20 }
 0x1b1   : > { %v3085_v34 = vpop.f32.mrf.mxu3 }
 0x1b3   : > { %v1331_v35 = vpop.f32.mrf.mxu2  ;;  %v1155_v38 = vpop.f32.mrf.mxu0 }
 0x1b4   : > { %v3087_v36 = vadd.f32 %v1331_v35, %v1243_v31  ;;  %v1156_v9 = vadd.f32 %v2856_v7, %v1155_v38  ;;  %v1244_v39 = vpop.f32.mrf.mxu1  ;;  %v528_v31 = vld [vmem:[%s2738_s11 + $0x6e0] sm:$0xff]  ;;  %v410_v35 = vld [vmem:[%s2738_s11 + $0x330] sm:$0xff]  ;;  %v417_v38 = vld [vmem:[%s2738_s11 + $0x368] sm:$0xff] }
 0x1b5   : > { %v640_v49 = vpack.c.bf16 %v528_v31, %v521_v12  ;;  %v585_v53 = vpack.c.bf16 %v417_v38, %v410_v35  ;;  %v433_v12 = vld [vmem:[%s2738_s11 + $0x3e8] sm:$0xff]  ;;  %v432_v35 = vld [vmem:[%s2738_s11 + $0x3e0] sm:$0xff] }
 0x1b6   : > { %v1245_v44 = vadd.f32 %v1244_v39, %v1156_v9  ;;  %v411_v9 = vld [vmem:[%s2738_s11 + $0x338] sm:$0xff]  ;;  %v418_v39 = vld [vmem:[%s2738_s11 + $0x370] sm:$0xff]  ;;  %v425_v31 = vld [vmem:[%s2738_s11 + $0x3a8] sm:$0xff] }
 0x1b7   : > { %v586_v59 = vpack.c.bf16 %v418_v39, %v411_v9 }
 0x1b9   : > { %v3098_v37 = vpop.f32.mrf.mxu3 }
 0x1bb   : > { %v1333_v60 = vpop.f32.mrf.mxu2  ;;  %v1158_v5 = vpop.f32.mrf.mxu0 }
 0x1bc   : > { %v3100_v45 = vadd.f32 %v1333_v60, %v1245_v44  ;;  %v1159_v10 = vadd.f32 %v2856_v7, %v1158_v5  ;;  %v1247_v11 = vpop.f32.mrf.mxu1  ;;  %v412_v44 = vld [vmem:[%s2738_s11 + $0x340] sm:$0xff] }
 0x1bd   : > { %v587_v60 = vpack.c.bf16 %v419_v46, %v412_v44 }
 0x1be   : > { %v1248_v13 = vadd.f32 %v1247_v11, %v1159_v10  ;;  %1434 = vmatmul.bf16.gmra.mxu3 %v633_v63  ;;  %1483 = vmatmul.bf16.gmra.mxu0 %v578_v0 }
 0x1bf   : > { %1572 = vmatmul.bf16.gmra.mxu1 %v579_v6 }
 0x1c0   : > { %2177 = vmatmul.msk.bf16.gmra.mxu2 %vm1040_vm0, %v580_v8 }
 0x1c1   : > { %v3104_v15 = vpop.f32.mrf.mxu3 }
 0x1c3   : > { %v1336_v3 = vpop.f32.mrf.mxu2  ;;  %v1160_v26 = vpop.f32.mrf.mxu0 }
 0x1c4   : > { %v3106_v21 = vadd.f32 %v1336_v3, %v1248_v13  ;;  %v1161_v17 = vadd.f32 %v2856_v7, %v1160_v26  ;;  %v1249_v20 = vpop.f32.mrf.mxu1 }
 0x1c6   : > { %v1250_v23 = vadd.f32 %v1249_v20, %v1161_v17  ;;  %v424_v17 = vld [vmem:[%s2738_s11 + $0x3a0] sm:$0xff]  ;;  %v431_v20 = vld [vmem:[%s2738_s11 + $0x3d8] sm:$0xff] }
 0x1c7   : > { %v592_v39 = vpack.c.bf16 %v431_v20, %v424_v17  ;;  %v447_v17 = vld [vmem:[%s2738_s11 + $0x458] sm:$0xff] }
 0x1c8   : > { %v439_v20 = vld [vmem:[%s2738_s11 + $0x418] sm:$0xff] }
 0x1c9   : > { %v3117_v47 = vpop.f32.mrf.mxu3 }
 0x1cb   : > { %v1338_v48 = vpop.f32.mrf.mxu2  ;;  %v1163_v56 = vpop.f32.mrf.mxu0 }
 0x1cc   : > { %v3119_v55 = vadd.f32 %v1338_v48, %v1250_v23  ;;  %v1164_v63 = vadd.f32 %v2856_v7, %v1163_v56  ;;  %v1252_v0 = vpop.f32.mrf.mxu1  ;;  %v426_v23 = vld [vmem:[%s2738_s11 + $0x3b0] sm:$0xff] }
 0x1cd   : > { %v594_v48 = vpack.c.bf16 %v433_v12, %v426_v23  ;;  %v446_v23 = vld [vmem:[%s2738_s11 + $0x450] sm:$0xff] }
 0x1ce   : > { %v1253_v5 = vadd.f32 %v1252_v0, %v1164_v63  ;;  %1439 = vmatmul.bf16.gmra.mxu3 %v640_v49  ;;  %1488 = vmatmul.bf16.gmra.mxu0 %v585_v53  ;;  %v593_v49 = vpack.c.bf16 %v432_v35, %v425_v31 }
 0x1cf   : > { %1577 = vmatmul.bf16.gmra.mxu1 %v586_v59 }
 0x1d0   : > { %2178 = vmatmul.msk.bf16.gmra.mxu2 %vm1040_vm0, %v587_v60 }
 0x1d1   : > { %v3123_v6 = vpop.f32.mrf.mxu3 }
 0x1d3   : > { %v1341_v8 = vpop.f32.mrf.mxu2  ;;  %v1165_v11 = vpop.f32.mrf.mxu0 }
 0x1d4   : > { %v3125_v10 = vadd.f32 %v1341_v8, %v1253_v5  ;;  %v1166_v13 = vadd.f32 %v2856_v7, %v1165_v11  ;;  %v1254_v3 = vpop.f32.mrf.mxu1 }
 0x1d6   : > { %3386 = vst [vmem:[#allocation19_spill] sm:$0xff] %v3125_v10  ;;  %v1255_v26 = vadd.f32 %v1254_v3, %v1166_v13  ;;  %v438_v13 = vld [vmem:[%s2738_s11 + $0x410] sm:$0xff]  ;;  %v445_v3 = vld [vmem:[%s2738_s11 + $0x448] sm:$0xff] }
 0x1d7   : > { %v599_v35 = vpack.c.bf16 %v445_v3, %v438_v13  ;;  %v454_v13 = vld [vmem:[%s2738_s11 + $0x490] sm:$0xff]  ;;  %v461_v3 = vld [vmem:[%s2738_s11 + $0x4c8] sm:$0xff] }
 0x1d9   : > { %v3134_v38 = vpop.f32.mrf.mxu3 }
 0x1db   : > { %v1343_v9 = vpop.f32.mrf.mxu2  ;;  %v1454_v46 = vpop.f32.mrf.mxu0 }
 0x1dc   : > { %v3136_v44 = vadd.f32 %v1343_v9, %v1255_v26  ;;  %v1455_v7 = vadd.f32 %v1454_v46, %v2983_v32  ;;  %v1543_v53 = vpop.f32.mrf.mxu1  ;;  %v440_v26 = vld [vmem:[%s2738_s11 + $0x420] sm:$0xff] }
 0x1dd   : > { %v601_v46 = vpack.c.bf16 %v447_v17, %v440_v26  ;;  %v453_v26 = vld [vmem:[%s2738_s11 + $0x488] sm:$0xff]  ;;  %v460_v17 = vld [vmem:[%s2738_s11 + $0x4c0] sm:$0xff] }
 0x1de   : > { %3387 = vst [vmem:[#allocation20_spill] sm:$0xff] %v3136_v44  ;;  %v1544_v56 = vadd.f32 %v1543_v53, %v1455_v7  ;;  %1493 = vmatmul.bf16.gmra.mxu0 %v592_v39 }
 0x1df   : > { %1582 = vmatmul.bf16.gmra.mxu1 %v593_v49 }
 0x1e0   : > { %2179 = vmatmul.msk.bf16.gmra.mxu2 %vm1040_vm0, %v594_v48 }
 0x1e1   : > { %v1405_v59 = vpop.f32.mrf.mxu3 }
 0x1e2   : > { %v3141_v60 = vadd.f32 %v1405_v59, %v3027_v43 }
 0x1e3   : > { %v1632_v63 = vpop.f32.mrf.mxu2  ;;  %v1456_v5 = vpop.f32.mrf.mxu0 }
 0x1e4   : > { %v3143_v0 = vadd.f32 %v1632_v63, %v1544_v56  ;;  %v1457_v32 = vadd.f32 %v1456_v5, %v2997_v28  ;;  %v1545_v8 = vpop.f32.mrf.mxu1  ;;  %v600_v28 = vpack.c.bf16 %v446_v23, %v439_v20 }
 0x1e6   : > { %v1546_v11 = vadd.f32 %v1545_v8, %v1457_v32  ;;  %v452_v8 = vld [vmem:[%s2738_s11 + $0x480] sm:$0xff] }
 0x1e9   : > { %v1407_v12 = vpop.f32.mrf.mxu3 }
 0x1ea   : > { %v3153_v31 = vadd.f32 %v1407_v12, %v3041_v1 }
 0x1eb   : > { %v1634_v43 = vpop.f32.mrf.mxu2  ;;  %v1459_v39 = vpop.f32.mrf.mxu0 }
 0x1ec   : > { %v3155_v9 = vadd.f32 %v1634_v43, %v1546_v11  ;;  %v1460_v48 = vadd.f32 %v1459_v39, %v3004_v2  ;;  %v1548_v49 = vpop.f32.mrf.mxu1  ;;  %v459_v11 = vld [vmem:[%s2738_s11 + $0x4b8] sm:$0xff]  ;;  %v608_v39 = vpack.c.bf16 %v461_v3, %v454_v13  ;;  %v474_v3 = vld [vmem:[%s2738_s11 + $0x530] sm:$0xff] }
 0x1ed   : > { %v606_v12 = vpack.c.bf16 %v459_v11, %v452_v8  ;;  %v468_v8 = vld [vmem:[%s2738_s11 + $0x500] sm:$0xff]  ;;  %v475_v11 = vld [vmem:[%s2738_s11 + $0x538] sm:$0xff] }
 0x1ee   : > { %v1549_v7 = vadd.f32 %v1548_v49, %v1460_v48  ;;  %1498 = vmatmul.bf16.gmra.mxu0 %v599_v35  ;;  %v467_v13 = vld [vmem:[%s2738_s11 + $0x4f8] sm:$0xff] }
 0x1ef   : > { %1587 = vmatmul.bf16.gmra.mxu1 %v600_v28 }
 0x1f0   : > { %2180 = vmatmul.msk.bf16.gmra.mxu2 %vm1040_vm0, %v601_v46 }
 0x1f1   : > { %v1410_v1 = vpop.f32.mrf.mxu3 }
 0x1f2   : > { %v3160_v53 = vadd.f32 %v1410_v1, %v3048_v18 }
 0x1f3   : > { %v1637_v56 = vpop.f32.mrf.mxu2  ;;  %v1461_v63 = vpop.f32.mrf.mxu0 }
 0x1f4   : > { %v3162_v59 = vadd.f32 %v1637_v56, %v1549_v7  ;;  %v1462_v2 = vadd.f32 %v1461_v63, %v3018_v54  ;;  %v1550_v5 = vpop.f32.mrf.mxu1  ;;  %v607_v54 = vpack.c.bf16 %v460_v17, %v453_v26 }
 0x1f6   : > { %v1551_v32 = vadd.f32 %v1550_v5, %v1462_v2  ;;  %v466_v5 = vld [vmem:[%s2738_s11 + $0x4f0] sm:$0xff] }
 0x1f9   : > { %v1412_v20 = vpop.f32.mrf.mxu3 }
 0x1fa   : > { %v3172_v23 = vadd.f32 %v1412_v20, %v3062_v41 }
 0x1fb   : > { %v1639_v18 = vpop.f32.mrf.mxu2  ;;  %v1464_v35 = vpop.f32.mrf.mxu0 }
 0x1fc   : > { %v3174_v43 = vadd.f32 %v1639_v18, %v1551_v32  ;;  %v1465_v46 = vadd.f32 %v1464_v35, %v3025_v40  ;;  %v1553_v28 = vpop.f32.mrf.mxu1  ;;  %v473_v32 = vld [vmem:[%s2738_s11 + $0x528] sm:$0xff]  ;;  %v615_v35 = vpack.c.bf16 %v475_v11, %v468_v8  ;;  %v488_v11 = vld [vmem:[%s2738_s11 + $0x5a0] sm:$0xff] }
 0x1fd   : > { %v613_v20 = vpack.c.bf16 %v473_v32, %v466_v5  ;;  %v482_v5 = vld [vmem:[%s2738_s11 + $0x570] sm:$0xff]  ;;  %v489_v32 = vld [vmem:[%s2738_s11 + $0x5a8] sm:$0xff] }
 0x1fe   : > { %v1554_v48 = vadd.f32 %v1553_v28, %v1465_v46  ;;  %1503 = vmatmul.bf16.gmra.mxu0 %v606_v12  ;;  %v481_v8 = vld [vmem:[%s2738_s11 + $0x568] sm:$0xff] }
 0x1ff   : > { %1592 = vmatmul.bf16.gmra.mxu1 %v607_v54 }
 0x200   : > { %2181 = vmatmul.msk.bf16.gmra.mxu2 %vm1040_vm0, %v608_v39 }
 0x201   : > { %v1415_v41 = vpop.f32.mrf.mxu3 }
 0x202   : > { %v3179_v49 = vadd.f32 %v1415_v41, %v3068_v58 }
 0x203   : > { %v1642_v7 = vpop.f32.mrf.mxu2  ;;  %v1466_v56 = vpop.f32.mrf.mxu0 }
 0x204   : > { %v3181_v1 = vadd.f32 %v1642_v7, %v1554_v48  ;;  %v1467_v40 = vadd.f32 %v1466_v56, %v3039_v24  ;;  %v1555_v63 = vpop.f32.mrf.mxu1  ;;  %v614_v24 = vpack.c.bf16 %v474_v3, %v467_v13  ;;  %v1386_v3 = vadd.f32 %v3066_v19, %v2944_v30 }
 0x205   : > { %v1388_v19 = vadd.f32 %v3079_v42, %v2958_v50 }
 0x206   : > { %v1556_v2 = vadd.f32 %v1555_v63, %v1467_v40  ;;  %v480_v63 = vld [vmem:[%s2738_s11 + $0x560] sm:$0xff] }
 0x209   : > { %v1417_v26 = vpop.f32.mrf.mxu3 }
 0x20a   : > { %v3191_v17 = vadd.f32 %v1417_v26, %v3081_v25 }
 0x20b   : > { %v1644_v58 = vpop.f32.mrf.mxu2  ;;  %v1469_v12 = vpop.f32.mrf.mxu0 }
 0x20c   : > { %v3193_v18 = vadd.f32 %v1644_v58, %v1556_v2  ;;  %v1470_v39 = vadd.f32 %v1469_v12, %v3046_v16  ;;  %v1558_v54 = vpop.f32.mrf.mxu1  ;;  %v487_v2 = vld [vmem:[%s2738_s11 + $0x598] sm:$0xff]  ;;  %v622_v12 = vpack.c.bf16 %v489_v32, %v482_v5 }
 0x20d   : > { %v620_v58 = vpack.c.bf16 %v487_v2, %v480_v63  ;;  %v501_v63 = vld [vmem:[%s2738_s11 + $0x608] sm:$0xff]  ;;  %v496_v2 = vld [vmem:[%s2738_s11 + $0x5e0] sm:$0xff]  ;;  %v503_v5 = vld [vmem:[%s2738_s11 + $0x618] sm:$0xff] }
 0x20e   : > { %v1559_v46 = vadd.f32 %v1558_v54, %v1470_v39  ;;  %1508 = vmatmul.bf16.gmra.mxu0 %v613_v20  ;;  %v495_v32 = vld [vmem:[%s2738_s11 + $0x5d8] sm:$0xff] }
 0x20f   : > { %1597 = vmatmul.bf16.gmra.mxu1 %v614_v24 }
 0x210   : > { %2182 = vmatmul.msk.bf16.gmra.mxu2 %vm1040_vm0, %v615_v35  ;;  %v621_v35 = vpack.c.bf16 %v488_v11, %v481_v8  ;;  %v502_v8 = vld [vmem:[%s2738_s11 + $0x610] sm:$0xff] }
 0x211   : > { %v1420_v25 = vpop.f32.mrf.mxu3 }
 0x212   : > { %v3198_v28 = vadd.f32 %v1420_v25, %v3087_v36 }
 0x213   : > { %v1647_v48 = vpop.f32.mrf.mxu2  ;;  %v1471_v7 = vpop.f32.mrf.mxu0 }
 0x214   : > { %v3200_v41 = vadd.f32 %v1647_v48, %v1559_v46  ;;  %v1472_v16 = vadd.f32 %v1471_v7, %v3060_v57  ;;  %v1560_v56 = vpop.f32.mrf.mxu1 }
 0x216   : > { %v1561_v40 = vadd.f32 %v1560_v56, %v1472_v16 }
 0x219   : > { %v1422_v13 = vpop.f32.mrf.mxu3 }
 0x21a   : > { %v3212_v36 = vadd.f32 %v1422_v13, %v3100_v45 }
 0x21b   : > { %v1649_v26 = vpop.f32.mrf.mxu2  ;;  %v1474_v57 = vpop.f32.mrf.mxu0 }
 0x21c   : > { %v3214_v20 = vadd.f32 %v1649_v26, %v1561_v40  ;;  %v1475_v24 = vadd.f32 %v1474_v57, %v1386_v3  ;;  %v1563_v39 = vpop.f32.mrf.mxu1  ;;  %v494_v40 = vld [vmem:[%s2738_s11 + $0x5d0] sm:$0xff]  ;;  %v629_v26 = vpack.c.bf16 %v503_v5, %v496_v2 }
 0x21e   : > { %v1564_v54 = vadd.f32 %v1563_v39, %v1475_v24  ;;  %1513 = vmatmul.bf16.gmra.mxu0 %v620_v58  ;;  %v628_v58 = vpack.c.bf16 %v502_v8, %v495_v32  ;;  %v508_v24 = vld [vmem:[%s2738_s11 + $0x640] sm:$0xff]  ;;  %v515_v39 = vld [vmem:[%s2738_s11 + $0x678] sm:$0xff]  ;;  %v522_v8 = vld [vmem:[%s2738_s11 + $0x6b0] sm:$0xff] }
 0x21f   : > { %1602 = vmatmul.bf16.gmra.mxu1 %v621_v35 }
 0x220   : > { %2183 = vmatmul.msk.bf16.gmra.mxu2 %vm1040_vm0, %v622_v12 }
 0x221   : > { %v1425_v30 = vpop.f32.mrf.mxu3 }
 0x222   : > { %v3220_v45 = vadd.f32 %v1425_v30, %v3106_v21  ;;  %v627_v21 = vpack.c.bf16 %v501_v63, %v494_v40  ;;  %v517_v30 = vld [vmem:[%s2738_s11 + $0x688] sm:$0xff] }
 0x223   : > { %v1652_v46 = vpop.f32.mrf.mxu2  ;;  %v1476_v48 = vpop.f32.mrf.mxu0 }
 0x224   : > { %v3222_v25 = vadd.f32 %v1652_v46, %v1564_v54  ;;  %v1477_v7 = vadd.f32 %v1476_v48, %v1388_v19  ;;  %v1565_v16 = vpop.f32.mrf.mxu1  ;;  %v510_v54 = vld [vmem:[%s2738_s11 + $0x650] sm:$0xff]  ;;  %v509_v19 = vld [vmem:[%s2738_s11 + $0x648] sm:$0xff]  ;;  %v516_v46 = vld [vmem:[%s2738_s11 + $0x680] sm:$0xff] }
 0x225   : > { %v635_v40 = vpack.c.bf16 %v516_v46, %v509_v19  ;;  %v1403_v46 = vadd.f32 %v3134_v38, %v3020_v27  ;;  %v1396_v27 = vadd.f32 %v3104_v15, %v2985_v33 }
 0x226   : > { %v1566_v56 = vadd.f32 %v1565_v16, %v1477_v7  ;;  %v634_v7 = vpack.c.bf16 %v515_v39, %v508_v24 }
 0x229   : > { %v1427_v11 = vpop.f32.mrf.mxu3 }
 0x22a   : > { %v3231_v50 = vadd.f32 %v1427_v11, %v3119_v55  ;;  %v529_v11 = vld [vmem:[%s2738_s11 + $0x6e8] sm:$0xff] }
 0x22b   : > { %v1654_v42 = vpop.f32.mrf.mxu2  ;;  %v3235_v3 = vpop.f32.mrf.mxu0  ;;  %v641_v24 = vpack.c.bf16 %v529_v11, %v522_v8  ;;  %v1398_v8 = vadd.f32 %v3117_v47, %v2999_v52 }
 0x22c   : > { %v3233_v13 = vadd.f32 %v1654_v42, %v1566_v56  ;;  %v3237_v57 = vpop.f32.mrf.mxu1  ;;  %v636_v56 = vpack.c.bf16 %v517_v30, %v510_v54  ;;  %v524_v42 = vld [vmem:[%s2738_s11 + $0x6c0] sm:$0xff] }
 0x22e   : > { %1518 = vmatmul.bf16.gmra.mxu0 %v627_v21  ;;  %v531_v21 = vld [vmem:[%s2738_s11 + $0x6f8] sm:$0xff] }
 0x22f   : > { %1607 = vmatmul.bf16.gmra.mxu1 %v628_v58  ;;  %v530_v58 = vld [vmem:[%s2738_s11 + $0x6f0] sm:$0xff]  ;;  %v643_v44 = vpack.c.bf16 %v531_v21, %v524_v42 }
 0x230   : > { %2184 = vmatmul.msk.bf16.gmra.mxu2 %vm1040_vm0, %v629_v26  ;;  %v523_v26 = vld [vmem:[%s2738_s11 + $0x6b8] sm:$0xff] }
 0x231   : > { %v642_v54 = vpack.c.bf16 %v530_v58, %v523_v26 }
 0x233   : > { %v3240_v55 = vpop.f32.mrf.mxu2  ;;  %v1481_v12 = vpop.f32.mrf.mxu0 }
 0x234   : > { %v3242_v35 = vpop.f32.mrf.mxu1 }
 0x23b   : > { %v3250_v48 = vpop.f32.mrf.mxu2  ;;  %v1484_v16 = vpop.f32.mrf.mxu0 }
 0x23c   : > { %v1573_v63 = vpop.f32.mrf.mxu1 }
 0x23e   : > { %1523 = vmatmul.bf16.gmra.mxu0 %v634_v7 }
 0x23f   : > { %1612 = vmatmul.bf16.gmra.mxu1 %v635_v40  ;;  %v1401_v40 = vadd.f32 %v3123_v6, %v3006_v4  ;;  %v1485_v6 = vadd.f32 %v1484_v16, %v1396_v27  ;;  %v1391_v16 = vadd.f32 %v3085_v34, %v2964_v62  ;;  %v1719_v27 = vmax.f32 %v3214_v20, 0.0 }
 0x240   : > { %2185 = vmatmul.msk.bf16.gmra.mxu2 %vm1040_vm0, %v636_v56 }
 0x243   : > { %v1662_v2 = vpop.f32.mrf.mxu2  ;;  %v1486_v5 = vpop.f32.mrf.mxu0 }
 0x244   : > { %v1575_v32 = vpop.f32.mrf.mxu1  ;;  %v1487_v21 = vadd.f32 %v1486_v5, %v1398_v8 }
 0x24b   : > { %v1664_v10 = vpop.f32.mrf.mxu2  ;;  %v1489_v39 = vpop.f32.mrf.mxu0 }
 0x24c   : > { %v1578_v30 = vpop.f32.mrf.mxu1  ;;  %v1490_v14 = vadd.f32 %v1489_v39, %v1401_v40  ;;  %v1576_v39 = vadd.f32 %v1575_v32, %v1487_v21  ;;  %v1721_v21 = vmax.f32 %v3233_v13, 0.0 }
 0x24e   : > { %1528 = vmatmul.bf16.gmra.mxu0 %v641_v24  ;;  %v1579_v26 = vadd.f32 %v1578_v30, %v1490_v14  ;;  %v1665_v52 = vadd.f32 %v1664_v10, %v1576_v39  ;;  %v1574_v30 = vadd.f32 %v1573_v63, %v1485_v6 }
 0x24f   : > { %1617 = vmatmul.bf16.gmra.mxu1 %v642_v54 }
 0x250   : > { %2186 = vmatmul.msk.bf16.gmra.mxu2 %vm1040_vm0, %v643_v44  ;;  %v1663_v32 = vadd.f32 %v1662_v2, %v1574_v30  ;;  %v1715_v30 = vmax.f32 %v3174_v43, 0.0 }
 0x253   : > { %v1667_v19 = vpop.f32.mrf.mxu2  ;;  %v1491_v7 = vpop.f32.mrf.mxu0 }
 0x254   : > { %v1580_v56 = vpop.f32.mrf.mxu1  ;;  %v1492_v29 = vadd.f32 %v1491_v7, %v1403_v46  ;;  %v1668_v38 = vadd.f32 %v1667_v19, %v1579_v26 }
 0x256   : > { %v1581_v11 = vadd.f32 %v1580_v56, %v1492_v29  ;;  %v1393_v29 = vadd.f32 %v3098_v37, %v2978_v22  ;;  %v1726_v47 = vmax.f32 %v1668_v38, 0.0  ;;  %v1480_v22 = vadd.f32 %v3235_v3, %v1391_v16 }
 0x258   : > { %v1482_v5 = vadd.f32 %v1481_v12, %v1393_v29  ;;  %v1724_v12 = vmax.f32 %v1663_v32, 0.0  ;;  %v1569_v7 = vadd.f32 %v3237_v57, %v1480_v22  ;;  %v1717_v29 = vmax.f32 %v3193_v18, 0.0 }
 0x259   : > { %v1713_v32 = vmax.f32 %v3155_v9, 0.0 }
 0x25a   : > { %v1571_v37 = vadd.f32 %v3242_v35, %v1482_v5  ;;  %v1658_v2 = vadd.f32 %v3240_v55, %v1569_v7 }
 0x25b   : > { %v1669_v42 = vpop.f32.mrf.mxu2  ;;  %v1494_v58 = vpop.f32.mrf.mxu0 }
 0x25c   : > { %v1670_v44 = vadd.f32 %v1669_v42, %v1581_v11  ;;  %v1495_v24 = vadd.f32 %v1494_v58, %v3141_v60  ;;  %v1583_v54 = vpop.f32.mrf.mxu1  ;;  %v1660_v10 = vadd.f32 %v3250_v48, %v1571_v37  ;;  %v1722_v35 = vmax.f32 %v1658_v2, 0.0 }
 0x25e   : > { %v1727_v61 = vmax.f32 %v1670_v44, 0.0  ;;  %v1584_v4 = vadd.f32 %v1583_v54, %v1495_v24  ;;  %v1723_v40 = vmax.f32 %v1660_v10, 0.0  ;;  %v1430_v10 = vpop.f32.mrf.mxu3 }
 0x260   : > { %1747 = vmatpush.xpose.msra.mxu3 %v1727_v61  ;;  %v1725_v61 = vmax.f32 %v1665_v52, 0.0 }
 0x263   : > { %v1672_v14 = vpop.f32.mrf.mxu2  ;;  %v1496_v60 = vpop.f32.mrf.mxu0 }
 0x264   : > { %v3271_v46 = vadd.f32 %v1672_v14, %v1584_v4  ;;  %1748 = vmatpush.xpose.msra.mxu3 %v1726_v47  ;;  %v1497_v33 = vadd.f32 %v1496_v60, %v3153_v31  ;;  %v1585_v15 = vpop.f32.mrf.mxu1 }
 0x266   : > { %v1586_v19 = vadd.f32 %v1585_v15, %v1497_v33 }
 0x268   : > { %1749 = vmatpush.xpose.msra.mxu3 %v1725_v61 }
 0x26b   : > { %v1674_v63 = vpop.f32.mrf.mxu2  ;;  %v1499_v31 = vpop.f32.mrf.mxu0 }
 0x26c   : > { %v3280_v56 = vadd.f32 %v1674_v63, %v1586_v19  ;;  %1750 = vmatpush.xpose.msra.mxu3 %v1724_v12  ;;  %v1500_v62 = vadd.f32 %v1499_v31, %v3160_v53  ;;  %v1588_v34 = vpop.f32.mrf.mxu1  ;;  %v1720_v53 = vmax.f32 %v3222_v25, 0.0 }
 0x26e   : > { %v1589_v3 = vadd.f32 %v1588_v34, %v1500_v62  ;;  %v1432_v34 = vpop.f32.mrf.mxu3 }
 0x270   : > { %1751 = vmatpush.xpose.msra.mxu3 %v1723_v40 }
 0x273   : > { %v1677_v8 = vpop.f32.mrf.mxu2  ;;  %v1501_v48 = vpop.f32.mrf.mxu0 }
 0x274   : > { %v3284_v11 = vadd.f32 %v1677_v8, %v1589_v3  ;;  %1752 = vmatpush.xpose.msra.mxu3 %v1722_v35  ;;  %v1502_v57 = vadd.f32 %v1501_v48, %v3172_v23  ;;  %v1590_v42 = vpop.f32.mrf.mxu1  ;;  %v1718_v23 = vmax.f32 %v3200_v41, 0.0 }
 0x276   : > { %v1591_v26 = vadd.f32 %v1590_v42, %v1502_v57  ;;  %v1435_v35 = vpop.f32.mrf.mxu3 }
 0x278   : > { %1753 = vmatpush.xpose.msra.mxu3 %v1721_v21 }
 0x27b   : > { %v1679_v44 = vpop.f32.mrf.mxu2  ;;  %v1504_v58 = vpop.f32.mrf.mxu0 }
 0x27c   : > { %v3289_v55 = vadd.f32 %v1679_v44, %v1591_v26  ;;  %1754 = vmatpush.xpose.msra.mxu3 %v1720_v53  ;;  %v1505_v24 = vadd.f32 %v1504_v58, %v3179_v49  ;;  %v1593_v54 = vpop.f32.mrf.mxu1  ;;  %v1716_v49 = vmax.f32 %v3181_v1, 0.0 }
 0x27e   : > { %v1594_v38 = vadd.f32 %v1593_v54, %v1505_v24  ;;  %v1437_v21 = vpop.f32.mrf.mxu3 }
 0x280   : > { %1755 = vmatpush.xpose.msra.mxu3 %v1719_v27 }
 0x283   : > { %v1682_v4 = vpop.f32.mrf.mxu2  ;;  %v1506_v6 = vpop.f32.mrf.mxu0 }
 0x284   : > { %v3294_v13 = vadd.f32 %v1682_v4, %v1594_v38  ;;  %1756 = vmatpush.xpose.msra.mxu3 %v1718_v23  ;;  %v1507_v25 = vadd.f32 %v1506_v6, %v3191_v17  ;;  %v1595_v39 = vpop.f32.mrf.mxu1  ;;  %v1714_v17 = vmax.f32 %v3162_v59, 0.0 }
 0x286   : > { %v1596_v52 = vadd.f32 %v1595_v39, %v1507_v25  ;;  %v1440_v24 = vpop.f32.mrf.mxu3  ;;  %v1744_v25 = vld [vmem:[#allocation9] sm:$0x1]  ;;  %v3388_v39 = vld [vmem:[#allocation18_spill] sm:$0xff] }
 0x288   : > { %1757 = vmatpush.xpose.msra.mxu3 %v1717_v29  ;;  %v1441_v29 = vadd.f32 %v1440_v24, %v3388_v39 }
 0x28b   : > { %v1684_v47 = vpop.f32.mrf.mxu2  ;;  %v1509_v14 = vpop.f32.mrf.mxu0 }
 0x28c   : > { %v3299_v20 = vadd.f32 %v1684_v47, %v1596_v52  ;;  %1758 = vmatpush.xpose.msra.mxu3 %v1716_v49  ;;  %v1510_v41 = vadd.f32 %v1509_v14, %v3198_v28  ;;  %v1598_v5 = vpop.f32.mrf.mxu1  ;;  %v1712_v28 = vmax.f32 %v3143_v0, 0.0  ;;  %v3389_v14 = vld [vmem:[#allocation17_spill] sm:$0xff] }
 0x28e   : > { %v1599_v60 = vadd.f32 %v1598_v5, %v1510_v41  ;;  %v1442_v38 = vpop.f32.mrf.mxu3  ;;  %v1438_v41 = vadd.f32 %v1437_v21, %v3389_v14 }
 0x28f   : > { %v1443_v4 = vadd.f32 %v1442_v38, %v2976_v51 }
 0x290   : > { %1759 = vmatpush.xpose.msra.mxu3 %v1715_v30 }
 0x293   : > { %v1687_v33 = vpop.f32.mrf.mxu2  ;;  %v1511_v15 = vpop.f32.mrf.mxu0 }
 0x294   : > { %v3304_v18 = vadd.f32 %v1687_v33, %v1599_v60  ;;  %1760 = vmatpush.xpose.msra.mxu3 %v1714_v17  ;;  %v1512_v1 = vadd.f32 %v1511_v15, %v3212_v36  ;;  %v1600_v16 = vpop.f32.mrf.mxu1  ;;  %v3390_v15 = vld [vmem:[#allocation16_spill] sm:$0xff] }
 0x296   : > { %v1601_v61 = vadd.f32 %v1600_v16, %v1512_v1  ;;  %v1436_v1 = vadd.f32 %v1435_v35, %v3390_v15 }
 0x298   : > { %1761 = vmatpush.xpose.msra.mxu3 %v1713_v32 }
 0x29b   : > { %v1689_v19 = vpop.f32.mrf.mxu2  ;;  %v1514_v22 = vpop.f32.mrf.mxu0 }
 0x29c   : > { %v3309_v43 = vadd.f32 %v1689_v19, %v1601_v61  ;;  %1762 = vmatpush.xpose.msra.mxu3 %v1712_v28  ;;  %v1515_v59 = vadd.f32 %v1514_v22, %v3220_v45  ;;  %v1603_v37 = vpop.f32.mrf.mxu1  ;;  %v3391_v28 = vld [vmem:[#allocation20_spill] sm:$0xff] }
 0x29d   : > { %v1433_v19 = vadd.f32 %v1432_v34, %v3391_v28 }
 0x29e   : > { %v1604_v12 = vadd.f32 %v1603_v37, %v1515_v59 }
 0x29f   : > { %1763 = vmatmul.f32.vlgmr.msra.gmra.mxu3 %v1744_v25 }
 0x2a3   : > { %v1692_v63 = vpop.f32.mrf.mxu2  ;;  %v1516_v36 = vpop.f32.mrf.mxu0 }
 0x2a4   : > { %v3312_v7 = vadd.f32 %v1692_v63, %v1604_v12  ;;  %v1517_v9 = vadd.f32 %v1516_v36, %v3231_v50  ;;  %v1605_v31 = vpop.f32.mrf.mxu1  ;;  %v3392_v63 = vld [vmem:[#allocation19_spill] sm:$0xff] }
 0x2a5   : > { %v1431_v36 = vadd.f32 %v1430_v10, %v3392_v63  ;;  %v1735_v10 = vmax.f32 %v3309_v43, 0.0  ;;  %v1728_v43 = vmax.f32 %v3271_v46, 0.0 }
 0x2a6   : > { %v1606_v62 = vadd.f32 %v1605_v31, %v1517_v9 }
 0x2ab   : > { %v1694_v0 = vpop.f32.mrf.mxu2  ;;  %v1519_v40 = vpop.f32.mrf.mxu0 }
 0x2ac   : > { %v1695_v2 = vadd.f32 %v1694_v0, %v1606_v62  ;;  %v1608_v3 = vpop.f32.mrf.mxu1  ;;  %v1520_v62 = vadd.f32 %v1519_v40, %v1431_v36  ;;  %v1734_v40 = vmax.f32 %v3304_v18, 0.0  ;;  %v1746_v18 = vstv %s1745_s30 }
 0x2ae   : > { %v1737_v24 = vmax.f32 %v1695_v2, 0.0  ;;  %v1730_v2 = vmax.f32 %v3284_v11, 0.0 }
 0x2b3   : > { %v1697_v8 = vpop.f32.mrf.mxu2  ;;  %v1521_v48 = vpop.f32.mrf.mxu0 }
 0x2b4   : > { %v1610_v45 = vpop.f32.mrf.mxu1  ;;  %v1522_v37 = vadd.f32 %v1521_v48, %v1433_v19  ;;  %v1736_v48 = vmax.f32 %v3312_v7, 0.0  ;;  %v1729_v7 = vmax.f32 %v3280_v56, 0.0 }
 0x2b6   : > { %v1611_v0 = vadd.f32 %v1610_v45, %v1522_v37  ;;  %v1733_v45 = vmax.f32 %v3299_v20, 0.0 }
 0x2bb   : > { %v1699_v57 = vpop.f32.mrf.mxu2  ;;  %v1524_v42 = vpop.f32.mrf.mxu0 }
 0x2bc   : > { %v1613_v26 = vpop.f32.mrf.mxu1  ;;  %v1525_v51 = vadd.f32 %v1524_v42, %v1436_v1  ;;  %v1700_v35 = vadd.f32 %v1699_v57, %v1611_v0 }
 0x2be   : > { %v1614_v12 = vadd.f32 %v1613_v26, %v1525_v51 }
 0x2c3   : > { %v1702_v53 = vpop.f32.mrf.mxu2  ;;  %v1526_v44 = vpop.f32.mrf.mxu0 }
 0x2c4   : > { %v1615_v58 = vpop.f32.mrf.mxu1  ;;  %v1527_v60 = vadd.f32 %v1526_v44, %v1438_v41  ;;  %v1703_v9 = vadd.f32 %v1702_v53, %v1614_v12  ;;  %v1609_v44 = vadd.f32 %v1608_v3, %v1520_v62  ;;  %v1732_v3 = vmax.f32 %v3294_v13, 0.0 }
 0x2c6   : > { %v1616_v61 = vadd.f32 %v1615_v58, %v1527_v60  ;;  %v1740_v21 = vmax.f32 %v1703_v9, 0.0  ;;  %v1698_v42 = vadd.f32 %v1697_v8, %v1609_v44  ;;  %v1739_v58 = vmax.f32 %v1700_v35, 0.0 }
 0x2c7   : > { %v1731_v8 = vmax.f32 %v3289_v55, 0.0 }
 0x2c8   : > { %v1738_v34 = vmax.f32 %v1698_v42, 0.0 }
 0x2cb   : > { %v1704_v50 = vpop.f32.mrf.mxu2  ;;  %v1529_v54 = vpop.f32.mrf.mxu0 }
 0x2cc   : > { %v1618_v27 = vpop.f32.mrf.mxu1  ;;  %v1530_v49 = vadd.f32 %v1529_v54, %v1441_v29  ;;  %v1705_v22 = vadd.f32 %v1704_v50, %v1616_v61  ;;  %v1837_v61 = vlaneseq }
 0x2ce   : > { %v1619_v17 = vadd.f32 %v1618_v27, %v1530_v49  ;;  %v1741_v31 = vmax.f32 %v1705_v22, 0.0  ;;  %vm1839_vm12 = vcmp.lt.s32.totalorder %v1837_v61, 256 }
 0x2d3   : > { %v1707_v23 = vpop.f32.mrf.mxu2  ;;  %v1531_v6 = vpop.f32.mrf.mxu0 }
 0x2d4   : > { %v1532_v52 = vadd.f32 %v1531_v6, %v1443_v4  ;;  %v1620_v47 = vpop.f32.mrf.mxu1  ;;  %v1708_v16 = vadd.f32 %v1707_v23, %v1619_v17 }
 0x2d6   : > { %v1621_v5 = vadd.f32 %v1620_v47, %v1532_v52  ;;  %v1742_v59 = vmax.f32 %v1708_v16, 0.0 }
 0x2db   : > { %v1709_v30 = vpop.f32.mrf.mxu2 }
 0x2dc   : > { %v1710_v33 = vadd.f32 %v1709_v30, %v1621_v5 }
 0x2de   : > { %v1743_v32 = vmax.f32 %v1710_v33, 0.0 }
 0x2e0   : > { %1767 = vmatpush.xpose.msrb.mxu3 %v1743_v32 }
 0x2e4   : > { %1768 = vmatpush.xpose.msrb.mxu3 %v1742_v59 }
 0x2e8   : > { %1769 = vmatpush.xpose.msrb.mxu3 %v1741_v31 }
 0x2ec   : > { %1770 = vmatpush.xpose.msrb.mxu3 %v1740_v21 }
 0x2f0   : > { %1771 = vmatpush.xpose.msrb.mxu3 %v1739_v58 }
 0x2f4   : > { %1772 = vmatpush.xpose.msrb.mxu3 %v1738_v34 }
 0x2f8   : > { %1773 = vmatpush.xpose.msrb.mxu3 %v1737_v24 }
 0x2fc   : > { %1774 = vmatpush.xpose.msrb.mxu3 %v1736_v48 }
 0x300   : > { %1775 = vmatpush.xpose.msrb.mxu3 %v1735_v10 }
 0x304   : > { %1776 = vmatpush.xpose.msrb.mxu3 %v1734_v40 }
 0x308   : > { %1777 = vmatpush.xpose.msrb.mxu3 %v1733_v45 }
 0x30c   : > { %1778 = vmatpush.xpose.msrb.mxu3 %v1732_v3 }
 0x310   : > { %1779 = vmatpush.xpose.msrb.mxu3 %v1731_v8 }
 0x314   : > { %1780 = vmatpush.xpose.msrb.mxu3 %v1730_v2 }
 0x318   : > { %1781 = vmatpush.xpose.msrb.mxu3 %v1729_v7 }
 0x31c   : > { %1782 = vmatpush.xpose.msrb.mxu3 %v1728_v43 }
 0x31f   : > { %1783 = vmatmul.f32.vlgmr.msrb.gmra.mxu3 %v1744_v25 }
 0x322   : > { %v1764_v20 = vpop.f32.mrf.mxu3 }
 0x323   : > { %v1765_v57 = vadd.f32 %v1764_v20, %v1746_v18 }
 0x325   : > { %v1787_v26 = vand.u32 2147483647, %v1765_v57  ;;  %vm1825_vm9 = vcmp.ge.f32.partialorder %v1765_v57, 0.0 }
 0x327   : > { %v1789_v13 = vsub.f32 0.0, %v1787_v26 }
 0x329   : > { %v1791_v53 = vmul.f32 1.442695, %v1789_v13 }
 0x32b   : > { %2343 = vpow2.f32 %v1791_v53 }
 0x331   : > { %v2344_v55 = vpop.eup %2343 }
 0x332   : > { %v1795_v50 = vadd.f32 1.0, %v2344_v55 }
 0x334   : > { %2345 = vrcp.f32 %v1795_v50  ;;  %vm1802_vm1 = vweird.f32 %v1795_v50  ;;  %v1806_v52 = vand.u32 2147483647, %v1795_v50  ;;  %v1808_v49 = vand.u32 2147483648, %v1795_v50 }
 0x336   : > { %vm1807_vm4 = vcmp.eq.f32.partialorder %v1806_v52, 8.507059e+37  ;;  %v1809_v5 = vor.u32 1.1754944e-38, %v1808_v49 }
 0x33a   : > { %v2346_v46 = vpop.eup %2345 }
 0x33b   : > { %v1798_v23 = vmul.f32 %v2346_v46, %v1795_v50  ;;  %vm1803_vm2 = vweird.f32 %v2346_v46 }
 0x33c   : > { %vm1804_vm3 = vmor %vm1802_vm1, %vm1803_vm2 }
 0x33d   : > { %v1799_v25 = vsub.f32 1.0, %v1798_v23 }
 0x33f   : > { %v1800_v39 = vmul.f32 %v2346_v46, %v1799_v25 }
 0x341   : > { %v1801_v47 = vadd.f32 %v2346_v46, %v1800_v39 }
 0x343   : > { %v1805_v60 = vsel %vm1804_vm3, %v2346_v46, %v1801_v47 }
 0x344   : > { %v1810_v1 = vsel %vm1807_vm4, %v1809_v5, %v1805_v60 }
 0x345   : > { %v1827_v28 = vsub.f32 1.0, %v1810_v1 }
 0x347   : > { %v1829_v37 = vsel %vm1825_vm9, %v1810_v1, %v1827_v28 }
 0x3a2   : > { %v1784_v54 = vpop.f32.mrf.mxu3 }
 0x3a3   : > { %v1785_v11 = vadd.f32 %v1784_v54, %v1746_v18 }
 0x3a5   : > { %v1788_v27 = vand.u32 2147483647, %v1785_v11  ;;  %vm1826_vm10 = vcmp.ge.f32.partialorder %v1785_v11, 0.0 }
 0x3a7   : > { %v1790_v56 = vsub.f32 0.0, %v1788_v27 }
 0x3a9   : > { %v1793_v38 = vmul.f32 1.442695, %v1790_v56 }
 0x3ab   : > { %2347 = vpow2.f32 %v1793_v38 }
 0x3b1   : > { %v2348_v4 = vpop.eup %2347 }
 0x3b2   : > { %v1796_v6 = vadd.f32 1.0, %v2348_v4 }
 0x3b4   : > { %2349 = vrcp.f32 %v1796_v6  ;;  %v1822_v30 = vand.u32 2147483648, %v1796_v6  ;;  %v1820_v33 = vand.u32 2147483647, %v1796_v6  ;;  %vm1816_vm6 = vweird.f32 %v1796_v6 }
 0x3b6   : > { %v1823_v16 = vor.u32 1.1754944e-38, %v1822_v30  ;;  %vm1821_vm8 = vcmp.eq.f32.partialorder %v1820_v33, 8.507059e+37 }
 0x3ba   : > { %v2350_v29 = vpop.eup %2349 }
 0x3bb   : > { %v1812_v14 = vmul.f32 %v2350_v29, %v1796_v6  ;;  %vm1817_vm5 = vweird.f32 %v2350_v29 }
 0x3bc   : > { %vm1818_vm7 = vmor %vm1816_vm6, %vm1817_vm5 }
 0x3bd   : > { %v1813_v41 = vsub.f32 1.0, %v1812_v14 }
 0x3bf   : > { %v1814_v17 = vmul.f32 %v2350_v29, %v1813_v41 }
 0x3c1   : > { %v1815_v15 = vadd.f32 %v2350_v29, %v1814_v17 }
 0x3c3   : > { %v1819_v32 = vsel %vm1818_vm7, %v2350_v29, %v1815_v15 }
 0x3c4   : > { %v1824_v51 = vsel %vm1821_vm8, %v1823_v16, %v1819_v32 }
 0x3c5   : > { %v1828_v19 = vsub.f32 1.0, %v1824_v51 }
 0x3c7   : > { %v1830_v22 = vsel %vm1826_vm10, %v1824_v51, %v1828_v19 }
 0x3c8   : > { %v1833_v59 = vrot.slane %v1830_v22, 7 }
 0x3ca   : > { %v1835_v12 = vsel %vm1834_vm11, %v1829_v37, %v1833_v59 }
 0x3cb   : > { %1841 = vst.msk [vmem:[%s300_s13] sm:$0x3] %vm1839_vm12, %v1835_v12 }
 0x3cc   : > { %2507 = shalt.err (!%p2504_p5)
}
 0x3cd   : > { %2280 = dma.vmem_to_hbm [thread:$0]  (%p2649_p11), %s1856_s4, 32, %s1858_s17, %s1843_s19  }
 0x3ce PF: > { %s1869_s14 = sand.u32 1, %s2542_s20   ;;  %p3393_p8 = scmp.ne.s32.totalorder %s3375_s7, 0 }
 0x3cf   : > { %p3394_p9 = scmp.ge.s32.totalorder %s2554_s23, 2  ;;  %s1870_s30 = scalar_lea.sflag [#allocation5], %s1869_s14 }
 0x3d1   : > { %p2293_p4 = pnand %p3394_p9, %p3393_p8 }
 0x3d3   : > { %p2294_p12 = pneg %p2293_p4 }
 0x3d5   : > { %2537 = dma.done.wait (%p2294_p12), %s1870_s30, 32  }
 0x3d6   : > { %2539 = vsyncadd (%p2294_p12), %s1870_s30, 4294967264  ;;  %p21_p13 = scmp.ge.s32.totalorder %s2622_s25, 4   ;;  %s3395_s20 = smov %s2546_s21 }
 0x3d7   : > { %s3396_s21 = smov %s2550_s22  ;;  %s3397_s22 = smov %s2634_s28 }
 0x3d8   : > { %s3398_s23 = smov %s2622_s25  ;;  %23 = sbr.rel (!%p21_p13) target bundleno = 9 (0x9), region = 97 }
 0x3dd   :  { %1876 = vsyncpa [#allocation4], 1 }
 0x3de   :  { %1878 = vsyncpa [#allocation4 + $0x1], 1 }
 0x3df   :  { %1879 = vsyncpa [#allocation7], 1 }
 0x3e0   :  { %1880 = vsyncpa [#allocation10], 1 }
 0x3e1   :  { %1881 = vsyncpa [#allocation5], 1 }
 0x3e2   :  { %1883 = vsyncpa [#allocation5 + $0x1], 1 }

</bundles_post_ra>
